<compile_context>
chip_gen: v7x
topology: tpu7x:2x2x1
jax: 0.10.0
libtpu: 0.0.40
codegen_flags: <defaults>
</compile_context>

<pallas_src>
import functools
import math

import jax
import jax.numpy as jnp
from jax import lax
from jax.experimental import pallas as pl
from jax.experimental.pallas import tpu as pltpu

_INV_SQRT2 = 1.0 / math.sqrt(2.0)


def _gelu_exact(v):
    # nn.GELU() default = exact erf-based gelu (NOT the tanh approximation).
    return 0.5 * v * (1.0 + lax.erf(v * _INV_SQRT2))


# --------------------------------------------------------------------------
# Kernel
# --------------------------------------------------------------------------
def _sa_kernel(w1_ref, b1_ref, mw_ref, mb_ref, pw2_ref, w2_ref, b2_ref,
               x_ref, xu_ref, xd_ref, o_ref,
               *, C, H, W, TR, HB, use_mxu):
    S = TR + 4                      # slab rows: TR + 2-row halo on each side
    r = pl.program_id(1)

    # ---- assemble the (C, S, W) input slab from main tile + halo blocks ----
    x_up = xu_ref[0, :, HB - 2:HB, :]        # last 2 rows of the "up" block
    x_mid = x_ref[0]
    x_dn = xd_ref[0, :, 0:2, :]              # first 2 rows of the "down" block
    slab = jnp.concatenate([x_up, x_mid, x_dn], axis=1).astype(jnp.float32)

    # Rows outside the image must read as zero (global conv zero-padding); the
    # clamped halo blocks otherwise carry junk at the first / last row tile.
    gi = lax.broadcasted_iota(jnp.int32, (S, W), 0) + (r * TR - 2)
    row_ok = jnp.logical_and(gi >= 0, gi < H).astype(jnp.float32)
    slab = slab * row_ok[None]

    def dw3x3(x, w_ref, b_ref):
        """Depthwise 3x3, stride 1, zero pad 1, vectorized over channels."""
        zr = jnp.zeros((C, 1, W), jnp.float32)
        zc = jnp.zeros((C, S, 1), jnp.float32)
        x_um = jnp.concatenate([zr, x[:, :S - 1, :]], axis=1)   # row s -> x[s-1]
        x_dm = jnp.concatenate([x[:, 1:, :], zr], axis=1)       # row s -> x[s+1]
        rows = (x_um, x, x_dm)                                  # ky = 0, 1, 2
        acc = None
        for kx in range(3):
            # combine the 3 row taps for this kernel column, then shift once
            s = (rows[0] * w_ref[kx]          # (C,1,1) broadcast weights
                 + rows[1] * w_ref[3 + kx]
                 + rows[2] * w_ref[6 + kx])
            if kx == 0:        # needs s[.., w-1]
                s = jnp.concatenate([zc, s[:, :, :W - 1]], axis=2)
            elif kx == 2:      # needs s[.., w+1]
                s = jnp.concatenate([s[:, :, 1:], zc], axis=2)
            acc = s if acc is None else acc + s
        return acc + b_ref[...]

    def mix1x1(t, w_ref, b=None):
        """1x1 channel mix.  MXU matmul for C>=16; VPU broadcast-MAC otherwise."""
        if use_mxu:
            y = jnp.dot(w_ref[...], t.reshape(C, S * W),
                        preferred_element_type=jnp.float32).reshape(C, S, W)
        else:
            y = w_ref[0] * t[0][None]
            for ci in range(1, C):
                y = y + w_ref[ci] * t[ci][None]
        if b is not None:
            y = y + b
        return y

    # StridedConv.conv (DepthWiseConv): dw3x3(+bias); its pw is folded below.
    y = dw3x3(slab, w1_ref, b1_ref)
    # pw1 -> conv1x1(+bias) -> BatchNorm(eval): single fused matrix + bias.
    y = mix1x1(y, mw_ref, mb_ref[...])
    # StridedConv GELU, then SA's extra GELU.
    y = _gelu_exact(_gelu_exact(y))
    # BSConvU: pw 1x1 (no bias) then dw3x3(+bias).
    y = mix1x1(y, pw2_ref)
    y = y * row_ok[None]          # dw2's zero padding at the global image border
    y = dw3x3(y, w2_ref, b2_ref)
    # sigmoid on the valid TR rows; single 3-D store (no stack).
    o_ref[0] = jax.nn.sigmoid(y[:, 2:TR + 2, :]).astype(o_ref.dtype)


# --------------------------------------------------------------------------
# Wrapper
# --------------------------------------------------------------------------
def _zero_index(b, r, nd):
    return (0,) * nd


def _choose_row_tile(H, W, C, target_bytes):
    """Largest multiple-of-8 divisor of H whose f32 slab fits target_bytes."""
    if H % 8 != 0:
        return H                                   # fall back to full image
    best = 8
    for tr in range(8, H + 1, 8):
        if H % tr == 0 and C * (tr + 4) * W * 4 <= target_bytes:
            best = tr
    return best


def prepare_kernel_params(p, C, use_mxu):
    """Fold pw1 @ conv1x1 @ BN(eval) and pre-shape everything for the kernel."""
    hi = lax.Precision.HIGHEST
    scale = p["bn_gamma"] / jnp.sqrt(p["bn_rvar"] + p["bn_eps"])
    shift = p["bn_beta"] - p["bn_rmean"] * scale

    pw1 = p["pw1_w"][:, :, 0, 0]                     # (O, I)
    c11 = p["c11_w"][:, :, 0, 0]                     # (O, I)
    mix_oi = jnp.matmul(c11, pw1, precision=hi) * scale[:, None]   # (Cout, Cin)
    mix_b = p["c11_b"] * scale + shift
    pw2_oi = p["pw2_w"][:, :, 0, 0]                  # (Cout, Cin)

    def dw9(w):   # (C,1,3,3) -> (9, C, 1, 1), k = ky*3 + kx
        return jnp.transpose(w[:, 0], (1, 2, 0)).reshape(9, C)[:, :, None, None]

    if use_mxu:
        mix_w = mix_oi                               # (Cout, Cin) for jnp.dot
        pw2_w = pw2_oi
    else:
        mix_w = jnp.transpose(mix_oi)[:, :, None, None]   # (Cin, Cout, 1, 1)
        pw2_w = jnp.transpose(pw2_oi)[:, :, None, None]

    return (dw9(p["dw1_w"]).astype(jnp.float32),
            p["dw1_b"].reshape(C, 1, 1).astype(jnp.float32),
            mix_w.astype(jnp.float32),
            mix_b.reshape(C, 1, 1).astype(jnp.float32),
            pw2_w.astype(jnp.float32),
            dw9(p["dw2_w"]).astype(jnp.float32),
            p["dw2_b"].reshape(C, 1, 1).astype(jnp.float32))


def sa_forward(x, params, *, row_tile=None, use_mxu=None,
               target_tile_bytes=2 << 20):
    N, C, H, W = x.shape
    assert H >= 2 and W >= 2
    if use_mxu is None:
        use_mxu = C >= 16
    TR = row_tile if row_tile is not None else _choose_row_tile(H, W, C,
                                                                target_tile_bytes)
    assert H % TR == 0 and (TR % 8 == 0 or TR == H), (H, TR)
    HB = 8 if H % 8 == 0 else H                      # halo block rows
    ratio = TR // HB
    nrow = H // TR
    last_hblk = H // HB - 1

    kparams = prepare_kernel_params(params, C, use_mxu)
    kern = functools.partial(_sa_kernel, C=C, H=H, W=W, TR=TR, HB=HB,
                             use_mxu=use_mxu)

    itemsize = x.dtype.itemsize
    slab_f32 = C * (TR + 4) * W * 4
    io_bytes = (2 * C * TR * W + 2 * C * HB * W) * itemsize
    wbytes = sum(int(a.size) * 4 for a in kparams)
    vmem_limit = int(min(100 << 20,
                         max(32 << 20,
                             2 * io_bytes + 10 * slab_f32 + 2 * wbytes + (4 << 20))))

    flops = int(N * H * W * (4 * C * C + 44 * C))
    transc = int(N * H * W * C * 3)                  # 2x erf + sigmoid
    bytes_acc = int(2 * N * C * H * W * itemsize + wbytes)

    weight_specs = [pl.BlockSpec(a.shape, functools.partial(_zero_index, nd=a.ndim))
                    for a in kparams]
    x_specs = [
        pl.BlockSpec((1, C, TR, W), lambda b, r: (b, 0, r, 0)),
        pl.BlockSpec((1, C, HB, W),
                     lambda b, r: (b, 0, jnp.maximum(r * ratio - 1, 0), 0)),
        pl.BlockSpec((1, C, HB, W),
                     lambda b, r: (b, 0, jnp.minimum((r + 1) * ratio, last_hblk), 0)),
    ]

    return pl.pallas_call(
        kern,
        out_shape=jax.ShapeDtypeStruct((N, C, H, W), x.dtype),
        grid=(N, nrow),
        in_specs=weight_specs + x_specs,
        out_specs=pl.BlockSpec((1, C, TR, W), lambda b, r: (b, 0, r, 0)),
        compiler_params=pltpu.CompilerParams(
            dimension_semantics=("parallel", "parallel"),
            vmem_limit_bytes=vmem_limit),
        cost_estimate=pl.CostEstimate(flops=flops, transcendentals=transc,
                                      bytes_accessed=bytes_acc),
    )(*kparams, x, x, x)


# --------------------------------------------------------------------------
# Parameters (PyTorch layout) + pure-JAX reference
# --------------------------------------------------------------------------
def init_params(key, C):
    ks = jax.random.split(key, 8)
    return dict(
        dw1_w=0.1 * jax.random.normal(ks[0], (C, 1, 3, 3), jnp.float32),
        dw1_b=0.1 * jax.random.normal(ks[1], (C,), jnp.float32),
        pw1_w=0.1 * jax.random.normal(ks[2], (C, C, 1, 1), jnp.float32),   # no bias
        c11_w=0.1 * jax.random.normal(ks[3], (C, C, 1, 1), jnp.float32),
        c11_b=0.1 * jax.random.normal(ks[4], (C,), jnp.float32),
        pw2_w=0.1 * jax.random.normal(ks[5], (C, C, 1, 1), jnp.float32),   # no bias
        dw2_w=0.1 * jax.random.normal(ks[6], (C, 1, 3, 3), jnp.float32),
        dw2_b=0.1 * jax.random.normal(ks[7], (C,), jnp.float32),
        bn_gamma=jnp.ones((C,), jnp.float32),
        bn_beta=jnp.zeros((C,), jnp.float32),
        bn_rmean=jnp.zeros((C,), jnp.float32),
        bn_rvar=jnp.ones((C,), jnp.float32),
        bn_eps=1e-5,
    )


def sa_reference(x, p):
    hi = lax.Precision.HIGHEST

    def conv(v, w, b=None, groups=1):
        pad = w.shape[2] // 2
        out = lax.conv_general_dilated(
            v, w, window_strides=(1, 1), padding=[(pad, pad), (pad, pad)],
            dimension_numbers=("NCHW", "OIHW", "NCHW"),
            feature_group_count=groups, precision=hi)
        if b is not None:
            out = out + b.reshape(1, -1, 1, 1)
        return out

    C = x.shape[1]
    y = conv(x, p["dw1_w"], p["dw1_b"], groups=C)
    y = conv(y, p["pw1_w"])
    y = conv(y, p["c11_w"], p["c11_b"])
    scale = (p["bn_gamma"] / jnp.sqrt(p["bn_rvar"] + p["bn_eps"])).reshape(1, -1, 1, 1)
    shift = (p["bn_beta"].reshape(1, -1, 1, 1)
             - p["bn_rmean"].reshape(1, -1, 1, 1) * scale)
    y = y * scale + shift
    y = _gelu_exact(_gelu_exact(y))
    y = conv(y, p["pw2_w"])
    y = conv(y, p["dw2_w"], p["dw2_b"], groups=C)
    return jax.nn.sigmoid(y)


if __name__ == "__main__":
    key = jax.random.PRNGKey(0)
    kx, kp = jax.random.split(key)
    # SA's assert requires out_channels == in_channels (spatial dims preserved).
    N, C, H, W = 2, 4, 16, 16
    x = jax.random.normal(kx, (N, C, H, W), jnp.float32)
    params = init_params(kp, C)
    ref = sa_reference(x, params)

    # Row-tiled path (2 row tiles -> exercises the halo / boundary masking).
    out_tiled = jax.block_until_ready(sa_forward(x, params, row_tile=8))
    assert out_tiled.shape == x.shape, (out_tiled.shape, x.shape)
    assert bool(jnp.all(jnp.isfinite(out_tiled)))
    assert bool(jnp.all((out_tiled > 0.0) & (out_tiled < 1.0)))     # sigmoid range
    err_tiled = float(jnp.max(jnp.abs(out_tiled - ref)))
    assert err_tiled < 5e-4, f"tiled mismatch vs reference: {err_tiled}"

    # Auto tile size (single row tile here) -> exercises the clamped-halo path.
    out_auto = jax.block_until_ready(sa_forward(x, params))
    err_auto = float(jnp.max(jnp.abs(out_auto - ref)))
    assert err_auto < 5e-4, f"auto-tile mismatch vs reference: {err_auto}"

    print("KERNEL_OK")
</pallas_src>

<mosaic_0001>
module attributes {stable_mosaic.version = 11 : i64} {
  func.func @_sa_kernel(%arg0: i32, %arg1: i32, %arg2: memref<9x4x1x1xf32, #tpu.memory_space<vmem>>, %arg3: memref<4x1x1xf32, #tpu.memory_space<vmem>>, %arg4: memref<4x4x1x1xf32, #tpu.memory_space<vmem>>, %arg5: memref<4x1x1xf32, #tpu.memory_space<vmem>>, %arg6: memref<4x4x1x1xf32, #tpu.memory_space<vmem>>, %arg7: memref<9x4x1x1xf32, #tpu.memory_space<vmem>>, %arg8: memref<4x1x1xf32, #tpu.memory_space<vmem>>, %arg9: memref<1x4x8x16xf32, #tpu.memory_space<vmem>>, %arg10: memref<1x4x8x16xf32, #tpu.memory_space<vmem>>, %arg11: memref<1x4x8x16xf32, #tpu.memory_space<vmem>>, %arg12: memref<1x4x8x16xf32, #tpu.memory_space<vmem>>) attributes {dimension_semantics = [#tpu.dimension_semantics<parallel>, #tpu.dimension_semantics<parallel>], iteration_bounds = array<i64: 2, 2>, scalar_prefetch = 0 : i64, scratch_operands = 0 : i64, tpu.core_type = #tpu.core_type<tc>, window_params = [{pipeline_mode = #tpu.pipeline_mode<synchronous>, transform_indices = @transform_0, window_bounds = array<i64: 9, 4, 1, 1>}, {pipeline_mode = #tpu.pipeline_mode<synchronous>, transform_indices = @transform_1, window_bounds = array<i64: 4, 1, 1>}, {pipeline_mode = #tpu.pipeline_mode<synchronous>, transform_indices = @transform_2, window_bounds = array<i64: 4, 4, 1, 1>}, {pipeline_mode = #tpu.pipeline_mode<synchronous>, transform_indices = @transform_3, window_bounds = array<i64: 4, 1, 1>}, {pipeline_mode = #tpu.pipeline_mode<synchronous>, transform_indices = @transform_4, window_bounds = array<i64: 4, 4, 1, 1>}, {pipeline_mode = #tpu.pipeline_mode<synchronous>, transform_indices = @transform_5, window_bounds = array<i64: 9, 4, 1, 1>}, {pipeline_mode = #tpu.pipeline_mode<synchronous>, transform_indices = @transform_6, window_bounds = array<i64: 4, 1, 1>}, {transform_indices = @transform_7, window_bounds = array<i64: 1, 4, 8, 16>}, {transform_indices = @transform_8, window_bounds = array<i64: 1, 4, 8, 16>}, {transform_indices = @transform_9, window_bounds = array<i64: 1, 4, 8, 16>}, {transform_indices = @transform_10, window_bounds = array<i64: 1, 4, 8, 16>}]} {
    %c0 = arith.constant 0 : index
    %c0_0 = arith.constant 0 : index
    %c6 = arith.constant 6 : index
    %c0_1 = arith.constant 0 : index
    %0 = vector.load %arg10[%c0, %c0_0, %c6, %c0_1] : memref<1x4x8x16xf32, #tpu.memory_space<vmem>>, vector<1x4x2x16xf32>
    %1 = vector.shape_cast %0 : vector<1x4x2x16xf32> to vector<4x2x16xf32>
    %c0_2 = arith.constant 0 : index
    %c0_3 = arith.constant 0 : index
    %c0_4 = arith.constant 0 : index
    %c0_5 = arith.constant 0 : index
    %2 = vector.load %arg9[%c0_2, %c0_3, %c0_4, %c0_5] : memref<1x4x8x16xf32, #tpu.memory_space<vmem>>, vector<1x4x8x16xf32>
    %3 = vector.shape_cast %2 : vector<1x4x8x16xf32> to vector<4x8x16xf32>
    %c0_6 = arith.constant 0 : index
    %c0_7 = arith.constant 0 : index
    %c0_8 = arith.constant 0 : index
    %c0_9 = arith.constant 0 : index
    %4 = vector.load %arg11[%c0_6, %c0_7, %c0_8, %c0_9] : memref<1x4x8x16xf32, #tpu.memory_space<vmem>>, vector<1x4x2x16xf32>
    %5 = vector.shape_cast %4 : vector<1x4x2x16xf32> to vector<4x2x16xf32>
    %6 = tpu.concatenate %1, %3, %5 in 1 : vector<4x2x16xf32>, vector<4x8x16xf32>, vector<4x2x16xf32> -> vector<4x12x16xf32>
    %7 = tpu.iota {dimensions = array<i32: 0>} : vector<12x16xi32>
    %c8_i32 = arith.constant 8 : i32
    %8 = arith.muli %arg1, %c8_i32 : i32
    %c2_i32 = arith.constant 2 : i32
    %9 = arith.subi %8, %c2_i32 : i32
    %10 = vector.broadcast %9 : i32 to vector<12x16xi32>
    %11 = arith.addi %7, %10 : vector<12x16xi32>
    %c0_i32 = arith.constant 0 : i32
    %12 = vector.broadcast %c0_i32 : i32 to vector<12x16xi32>
    %13 = arith.cmpi sge, %11, %12 : vector<12x16xi32>
    %c16_i32 = arith.constant 16 : i32
    %14 = vector.broadcast %c16_i32 : i32 to vector<12x16xi32>
    %15 = arith.cmpi slt, %11, %14 : vector<12x16xi32>
    %16 = arith.andi %13, %15 : vector<12x16xi1>
    %17 = arith.extui %16 : vector<12x16xi1> to vector<12x16xi32>
    %18 = arith.sitofp %17 : vector<12x16xi32> to vector<12x16xf32>
    %19 = vector.shape_cast %18 : vector<12x16xf32> to vector<1x12x16xf32>
    %20 = vector.broadcast %19 : vector<1x12x16xf32> to vector<4x12x16xf32>
    %21 = arith.mulf %6, %20 : vector<4x12x16xf32>
    %cst = arith.constant 0.000000e+00 : f32
    %22 = vector.broadcast %cst : f32 to vector<4x1x16xf32>
    %cst_10 = arith.constant 0.000000e+00 : f32
    %23 = vector.broadcast %cst_10 : f32 to vector<4x12x1xf32>
    %24 = vector.extract_strided_slice %21 {offsets = [0, 0, 0], sizes = [4, 11, 16], strides = [1, 1, 1]} : vector<4x12x16xf32> to vector<4x11x16xf32>
    %25 = tpu.concatenate %22, %24 in 1 : vector<4x1x16xf32>, vector<4x11x16xf32> -> vector<4x12x16xf32>
    %26 = vector.extract_strided_slice %21 {offsets = [0, 1, 0], sizes = [4, 11, 16], strides = [1, 1, 1]} : vector<4x12x16xf32> to vector<4x11x16xf32>
    %27 = tpu.concatenate %26, %22 in 1 : vector<4x11x16xf32>, vector<4x1x16xf32> -> vector<4x12x16xf32>
    %c0_11 = arith.constant 0 : index
    %c0_12 = arith.constant 0 : index
    %c0_13 = arith.constant 0 : index
    %c0_14 = arith.constant 0 : index
    %28 = vector.load %arg2[%c0_11, %c0_12, %c0_13, %c0_14] : memref<9x4x1x1xf32, #tpu.memory_space<vmem>>, vector<1x4x1x1xf32>
    %29 = vector.shape_cast %28 : vector<1x4x1x1xf32> to vector<4x1x1xf32>
    %30 = vector.broadcast %29 : vector<4x1x1xf32> to vector<4x12x16xf32>
    %31 = arith.mulf %25, %30 : vector<4x12x16xf32>
    %c3 = arith.constant 3 : index
    %c0_15 = arith.constant 0 : index
    %c0_16 = arith.constant 0 : index
    %c0_17 = arith.constant 0 : index
    %32 = vector.load %arg2[%c3, %c0_15, %c0_16, %c0_17] : memref<9x4x1x1xf32, #tpu.memory_space<vmem>>, vector<1x4x1x1xf32>
    %33 = vector.shape_cast %32 : vector<1x4x1x1xf32> to vector<4x1x1xf32>
    %34 = vector.broadcast %33 : vector<4x1x1xf32> to vector<4x12x16xf32>
    %35 = arith.mulf %21, %34 : vector<4x12x16xf32>
    %36 = arith.addf %31, %35 : vector<4x12x16xf32>
    %c6_18 = arith.constant 6 : index
    %c0_19 = arith.constant 0 : index
    %c0_20 = arith.constant 0 : index
    %c0_21 = arith.constant 0 : index
    %37 = vector.load %arg2[%c6_18, %c0_19, %c0_20, %c0_21] : memref<9x4x1x1xf32, #tpu.memory_space<vmem>>, vector<1x4x1x1xf32>
    %38 = vector.shape_cast %37 : vector<1x4x1x1xf32> to vector<4x1x1xf32>
    %39 = vector.broadcast %38 : vector<4x1x1xf32> to vector<4x12x16xf32>
    %40 = arith.mulf %27, %39 : vector<4x12x16xf32>
    %41 = arith.addf %36, %40 : vector<4x12x16xf32>
    %42 = vector.extract_strided_slice %41 {offsets = [0, 0, 0], sizes = [4, 12, 15], strides = [1, 1, 1]} : vector<4x12x16xf32> to vector<4x12x15xf32>
    %43 = tpu.concatenate %23, %42 in 2 : vector<4x12x1xf32>, vector<4x12x15xf32> -> vector<4x12x16xf32>
    %c1 = arith.constant 1 : index
    %c0_22 = arith.constant 0 : index
    %c0_23 = arith.constant 0 : index
    %c0_24 = arith.constant 0 : index
    %44 = vector.load %arg2[%c1, %c0_22, %c0_23, %c0_24] : memref<9x4x1x1xf32, #tpu.memory_space<vmem>>, vector<1x4x1x1xf32>
    %45 = vector.shape_cast %44 : vector<1x4x1x1xf32> to vector<4x1x1xf32>
    %46 = vector.broadcast %45 : vector<4x1x1xf32> to vector<4x12x16xf32>
    %47 = arith.mulf %25, %46 : vector<4x12x16xf32>
    %c4 = arith.constant 4 : index
    %c0_25 = arith.constant 0 : index
    %c0_26 = arith.constant 0 : index
    %c0_27 = arith.constant 0 : index
    %48 = vector.load %arg2[%c4, %c0_25, %c0_26, %c0_27] : memref<9x4x1x1xf32, #tpu.memory_space<vmem>>, vector<1x4x1x1xf32>
    %49 = vector.shape_cast %48 : vector<1x4x1x1xf32> to vector<4x1x1xf32>
    %50 = vector.broadcast %49 : vector<4x1x1xf32> to vector<4x12x16xf32>
    %51 = arith.mulf %21, %50 : vector<4x12x16xf32>
    %52 = arith.addf %47, %51 : vector<4x12x16xf32>
    %c7 = arith.constant 7 : index
    %c0_28 = arith.constant 0 : index
    %c0_29 = arith.constant 0 : index
    %c0_30 = arith.constant 0 : index
    %53 = vector.load %arg2[%c7, %c0_28, %c0_29, %c0_30] : memref<9x4x1x1xf32, #tpu.memory_space<vmem>>, vector<1x4x1x1xf32>
    %54 = vector.shape_cast %53 : vector<1x4x1x1xf32> to vector<4x1x1xf32>
    %55 = vector.broadcast %54 : vector<4x1x1xf32> to vector<4x12x16xf32>
    %56 = arith.mulf %27, %55 : vector<4x12x16xf32>
    %57 = arith.addf %52, %56 : vector<4x12x16xf32>
    %58 = arith.addf %43, %57 : vector<4x12x16xf32>
    %c2 = arith.constant 2 : index
    %c0_31 = arith.constant 0 : index
    %c0_32 = arith.constant 0 : index
    %c0_33 = arith.constant 0 : index
    %59 = vector.load %arg2[%c2, %c0_31, %c0_32, %c0_33] : memref<9x4x1x1xf32, #tpu.memory_space<vmem>>, vector<1x4x1x1xf32>
    %60 = vector.shape_cast %59 : vector<1x4x1x1xf32> to vector<4x1x1xf32>
    %61 = vector.broadcast %60 : vector<4x1x1xf32> to vector<4x12x16xf32>
    %62 = arith.mulf %25, %61 : vector<4x12x16xf32>
    %c5 = arith.constant 5 : index
    %c0_34 = arith.constant 0 : index
    %c0_35 = arith.constant 0 : index
    %c0_36 = arith.constant 0 : index
    %63 = vector.load %arg2[%c5, %c0_34, %c0_35, %c0_36] : memref<9x4x1x1xf32, #tpu.memory_space<vmem>>, vector<1x4x1x1xf32>
    %64 = vector.shape_cast %63 : vector<1x4x1x1xf32> to vector<4x1x1xf32>
    %65 = vector.broadcast %64 : vector<4x1x1xf32> to vector<4x12x16xf32>
    %66 = arith.mulf %21, %65 : vector<4x12x16xf32>
    %67 = arith.addf %62, %66 : vector<4x12x16xf32>
    %c8 = arith.constant 8 : index
    %c0_37 = arith.constant 0 : index
    %c0_38 = arith.constant 0 : index
    %c0_39 = arith.constant 0 : index
    %68 = vector.load %arg2[%c8, %c0_37, %c0_38, %c0_39] : memref<9x4x1x1xf32, #tpu.memory_space<vmem>>, vector<1x4x1x1xf32>
    %69 = vector.shape_cast %68 : vector<1x4x1x1xf32> to vector<4x1x1xf32>
    %70 = vector.broadcast %69 : vector<4x1x1xf32> to vector<4x12x16xf32>
    %71 = arith.mulf %27, %70 : vector<4x12x16xf32>
    %72 = arith.addf %67, %71 : vector<4x12x16xf32>
    %73 = vector.extract_strided_slice %72 {offsets = [0, 0, 1], sizes = [4, 12, 15], strides = [1, 1, 1]} : vector<4x12x16xf32> to vector<4x12x15xf32>
    %74 = tpu.concatenate %73, %23 in 2 : vector<4x12x15xf32>, vector<4x12x1xf32> -> vector<4x12x16xf32>
    %75 = arith.addf %58, %74 : vector<4x12x16xf32>
    %c0_40 = arith.constant 0 : index
    %c0_41 = arith.constant 0 : index
    %c0_42 = arith.constant 0 : index
    %76 = vector.load %arg3[%c0_40, %c0_41, %c0_42] : memref<4x1x1xf32, #tpu.memory_space<vmem>>, vector<4x1x1xf32>
    %77 = vector.broadcast %76 : vector<4x1x1xf32> to vector<4x12x16xf32>
    %78 = arith.addf %75, %77 : vector<4x12x16xf32>
    %c0_43 = arith.constant 0 : index
    %c0_44 = arith.constant 0 : index
    %c0_45 = arith.constant 0 : index
    %79 = vector.load %arg5[%c0_43, %c0_44, %c0_45] : memref<4x1x1xf32, #tpu.memory_space<vmem>>, vector<4x1x1xf32>
    %c0_46 = arith.constant 0 : index
    %c0_47 = arith.constant 0 : index
    %c0_48 = arith.constant 0 : index
    %c0_49 = arith.constant 0 : index
    %80 = vector.load %arg4[%c0_46, %c0_47, %c0_48, %c0_49] : memref<4x4x1x1xf32, #tpu.memory_space<vmem>>, vector<1x4x1x1xf32>
    %81 = vector.shape_cast %80 : vector<1x4x1x1xf32> to vector<4x1x1xf32>
    %82 = vector.extract_strided_slice %78 {offsets = [0, 0, 0], sizes = [1, 12, 16], strides = [1, 1, 1]} : vector<4x12x16xf32> to vector<1x12x16xf32>
    %83 = vector.shape_cast %82 : vector<1x12x16xf32> to vector<12x16xf32>
    %84 = vector.shape_cast %83 : vector<12x16xf32> to vector<1x12x16xf32>
    %85 = vector.broadcast %81 : vector<4x1x1xf32> to vector<4x12x16xf32>
    %86 = vector.broadcast %84 : vector<1x12x16xf32> to vector<4x12x16xf32>
    %87 = arith.mulf %85, %86 : vector<4x12x16xf32>
    %c1_50 = arith.constant 1 : index
    %c0_51 = arith.constant 0 : index
    %c0_52 = arith.constant 0 : index
    %c0_53 = arith.constant 0 : index
    %88 = vector.load %arg4[%c1_50, %c0_51, %c0_52, %c0_53] : memref<4x4x1x1xf32, #tpu.memory_space<vmem>>, vector<1x4x1x1xf32>
    %89 = vector.shape_cast %88 : vector<1x4x1x1xf32> to vector<4x1x1xf32>
    %90 = vector.extract_strided_slice %78 {offsets = [1, 0, 0], sizes = [1, 12, 16], strides = [1, 1, 1]} : vector<4x12x16xf32> to vector<1x12x16xf32>
    %91 = vector.shape_cast %90 : vector<1x12x16xf32> to vector<12x16xf32>
    %92 = vector.shape_cast %91 : vector<12x16xf32> to vector<1x12x16xf32>
    %93 = vector.broadcast %89 : vector<4x1x1xf32> to vector<4x12x16xf32>
    %94 = vector.broadcast %92 : vector<1x12x16xf32> to vector<4x12x16xf32>
    %95 = arith.mulf %93, %94 : vector<4x12x16xf32>
    %96 = arith.addf %87, %95 : vector<4x12x16xf32>
    %c2_54 = arith.constant 2 : index
    %c0_55 = arith.constant 0 : index
    %c0_56 = arith.constant 0 : index
    %c0_57 = arith.constant 0 : index
    %97 = vector.load %arg4[%c2_54, %c0_55, %c0_56, %c0_57] : memref<4x4x1x1xf32, #tpu.memory_space<vmem>>, vector<1x4x1x1xf32>
    %98 = vector.shape_cast %97 : vector<1x4x1x1xf32> to vector<4x1x1xf32>
    %99 = vector.extract_strided_slice %78 {offsets = [2, 0, 0], sizes = [1, 12, 16], strides = [1, 1, 1]} : vector<4x12x16xf32> to vector<1x12x16xf32>
    %100 = vector.shape_cast %99 : vector<1x12x16xf32> to vector<12x16xf32>
    %101 = vector.shape_cast %100 : vector<12x16xf32> to vector<1x12x16xf32>
    %102 = vector.broadcast %98 : vector<4x1x1xf32> to vector<4x12x16xf32>
    %103 = vector.broadcast %101 : vector<1x12x16xf32> to vector<4x12x16xf32>
    %104 = arith.mulf %102, %103 : vector<4x12x16xf32>
    %105 = arith.addf %96, %104 : vector<4x12x16xf32>
    %c3_58 = arith.constant 3 : index
    %c0_59 = arith.constant 0 : index
    %c0_60 = arith.constant 0 : index
    %c0_61 = arith.constant 0 : index
    %106 = vector.load %arg4[%c3_58, %c0_59, %c0_60, %c0_61] : memref<4x4x1x1xf32, #tpu.memory_space<vmem>>, vector<1x4x1x1xf32>
    %107 = vector.shape_cast %106 : vector<1x4x1x1xf32> to vector<4x1x1xf32>
    %108 = vector.extract_strided_slice %78 {offsets = [3, 0, 0], sizes = [1, 12, 16], strides = [1, 1, 1]} : vector<4x12x16xf32> to vector<1x12x16xf32>
    %109 = vector.shape_cast %108 : vector<1x12x16xf32> to vector<12x16xf32>
    %110 = vector.shape_cast %109 : vector<12x16xf32> to vector<1x12x16xf32>
    %111 = vector.broadcast %107 : vector<4x1x1xf32> to vector<4x12x16xf32>
    %112 = vector.broadcast %110 : vector<1x12x16xf32> to vector<4x12x16xf32>
    %113 = arith.mulf %111, %112 : vector<4x12x16xf32>
    %114 = arith.addf %105, %113 : vector<4x12x16xf32>
    %115 = vector.broadcast %79 : vector<4x1x1xf32> to vector<4x12x16xf32>
    %116 = arith.addf %114, %115 : vector<4x12x16xf32>
    %cst_62 = arith.constant 5.000000e-01 : f32
    %117 = vector.broadcast %cst_62 : f32 to vector<4x12x16xf32>
    %118 = arith.mulf %117, %116 : vector<4x12x16xf32>
    %cst_63 = arith.constant 0.707106769 : f32
    %119 = vector.broadcast %cst_63 : f32 to vector<4x12x16xf32>
    %120 = arith.mulf %116, %119 : vector<4x12x16xf32>
    %121 = math.erf %120 : vector<4x12x16xf32>
    %cst_64 = arith.constant 1.000000e+00 : f32
    %122 = vector.broadcast %cst_64 : f32 to vector<4x12x16xf32>
    %123 = arith.addf %122, %121 : vector<4x12x16xf32>
    %124 = arith.mulf %118, %123 : vector<4x12x16xf32>
    %cst_65 = arith.constant 5.000000e-01 : f32
    %125 = vector.broadcast %cst_65 : f32 to vector<4x12x16xf32>
    %126 = arith.mulf %125, %124 : vector<4x12x16xf32>
    %cst_66 = arith.constant 0.707106769 : f32
    %127 = vector.broadcast %cst_66 : f32 to vector<4x12x16xf32>
    %128 = arith.mulf %124, %127 : vector<4x12x16xf32>
    %129 = math.erf %128 : vector<4x12x16xf32>
    %cst_67 = arith.constant 1.000000e+00 : f32
    %130 = vector.broadcast %cst_67 : f32 to vector<4x12x16xf32>
    %131 = arith.addf %130, %129 : vector<4x12x16xf32>
    %132 = arith.mulf %126, %131 : vector<4x12x16xf32>
    %c0_68 = arith.constant 0 : index
    %c0_69 = arith.constant 0 : index
    %c0_70 = arith.constant 0 : index
    %c0_71 = arith.constant 0 : index
    %133 = vector.load %arg6[%c0_68, %c0_69, %c0_70, %c0_71] : memref<4x4x1x1xf32, #tpu.memory_space<vmem>>, vector<1x4x1x1xf32>
    %134 = vector.shape_cast %133 : vector<1x4x1x1xf32> to vector<4x1x1xf32>
    %135 = vector.extract_strided_slice %132 {offsets = [0, 0, 0], sizes = [1, 12, 16], strides = [1, 1, 1]} : vector<4x12x16xf32> to vector<1x12x16xf32>
    %136 = vector.shape_cast %135 : vector<1x12x16xf32> to vector<12x16xf32>
    %137 = vector.shape_cast %136 : vector<12x16xf32> to vector<1x12x16xf32>
    %138 = vector.broadcast %134 : vector<4x1x1xf32> to vector<4x12x16xf32>
    %139 = vector.broadcast %137 : vector<1x12x16xf32> to vector<4x12x16xf32>
    %140 = arith.mulf %138, %139 : vector<4x12x16xf32>
    %c1_72 = arith.constant 1 : index
    %c0_73 = arith.constant 0 : index
    %c0_74 = arith.constant 0 : index
    %c0_75 = arith.constant 0 : index
    %141 = vector.load %arg6[%c1_72, %c0_73, %c0_74, %c0_75] : memref<4x4x1x1xf32, #tpu.memory_space<vmem>>, vector<1x4x1x1xf32>
    %142 = vector.shape_cast %141 : vector<1x4x1x1xf32> to vector<4x1x1xf32>
    %143 = vector.extract_strided_slice %132 {offsets = [1, 0, 0], sizes = [1, 12, 16], strides = [1, 1, 1]} : vector<4x12x16xf32> to vector<1x12x16xf32>
    %144 = vector.shape_cast %143 : vector<1x12x16xf32> to vector<12x16xf32>
    %145 = vector.shape_cast %144 : vector<12x16xf32> to vector<1x12x16xf32>
    %146 = vector.broadcast %142 : vector<4x1x1xf32> to vector<4x12x16xf32>
    %147 = vector.broadcast %145 : vector<1x12x16xf32> to vector<4x12x16xf32>
    %148 = arith.mulf %146, %147 : vector<4x12x16xf32>
    %149 = arith.addf %140, %148 : vector<4x12x16xf32>
    %c2_76 = arith.constant 2 : index
    %c0_77 = arith.constant 0 : index
    %c0_78 = arith.constant 0 : index
    %c0_79 = arith.constant 0 : index
    %150 = vector.load %arg6[%c2_76, %c0_77, %c0_78, %c0_79] : memref<4x4x1x1xf32, #tpu.memory_space<vmem>>, vector<1x4x1x1xf32>
    %151 = vector.shape_cast %150 : vector<1x4x1x1xf32> to vector<4x1x1xf32>
    %152 = vector.extract_strided_slice %132 {offsets = [2, 0, 0], sizes = [1, 12, 16], strides = [1, 1, 1]} : vector<4x12x16xf32> to vector<1x12x16xf32>
    %153 = vector.shape_cast %152 : vector<1x12x16xf32> to vector<12x16xf32>
    %154 = vector.shape_cast %153 : vector<12x16xf32> to vector<1x12x16xf32>
    %155 = vector.broadcast %151 : vector<4x1x1xf32> to vector<4x12x16xf32>
    %156 = vector.broadcast %154 : vector<1x12x16xf32> to vector<4x12x16xf32>
    %157 = arith.mulf %155, %156 : vector<4x12x16xf32>
    %158 = arith.addf %149, %157 : vector<4x12x16xf32>
    %c3_80 = arith.constant 3 : index
    %c0_81 = arith.constant 0 : index
    %c0_82 = arith.constant 0 : index
    %c0_83 = arith.constant 0 : index
    %159 = vector.load %arg6[%c3_80, %c0_81, %c0_82, %c0_83] : memref<4x4x1x1xf32, #tpu.memory_space<vmem>>, vector<1x4x1x1xf32>
    %160 = vector.shape_cast %159 : vector<1x4x1x1xf32> to vector<4x1x1xf32>
    %161 = vector.extract_strided_slice %132 {offsets = [3, 0, 0], sizes = [1, 12, 16], strides = [1, 1, 1]} : vector<4x12x16xf32> to vector<1x12x16xf32>
    %162 = vector.shape_cast %161 : vector<1x12x16xf32> to vector<12x16xf32>
    %163 = vector.shape_cast %162 : vector<12x16xf32> to vector<1x12x16xf32>
    %164 = vector.broadcast %160 : vector<4x1x1xf32> to vector<4x12x16xf32>
    %165 = vector.broadcast %163 : vector<1x12x16xf32> to vector<4x12x16xf32>
    %166 = arith.mulf %164, %165 : vector<4x12x16xf32>
    %167 = arith.addf %158, %166 : vector<4x12x16xf32>
    %168 = vector.shape_cast %18 : vector<12x16xf32> to vector<1x12x16xf32>
    %169 = vector.broadcast %168 : vector<1x12x16xf32> to vector<4x12x16xf32>
    %170 = arith.mulf %167, %169 : vector<4x12x16xf32>
    %cst_84 = arith.constant 0.000000e+00 : f32
    %171 = vector.broadcast %cst_84 : f32 to vector<4x1x16xf32>
    %cst_85 = arith.constant 0.000000e+00 : f32
    %172 = vector.broadcast %cst_85 : f32 to vector<4x12x1xf32>
    %173 = vector.extract_strided_slice %170 {offsets = [0, 0, 0], sizes = [4, 11, 16], strides = [1, 1, 1]} : vector<4x12x16xf32> to vector<4x11x16xf32>
    %174 = tpu.concatenate %171, %173 in 1 : vector<4x1x16xf32>, vector<4x11x16xf32> -> vector<4x12x16xf32>
    %175 = vector.extract_strided_slice %170 {offsets = [0, 1, 0], sizes = [4, 11, 16], strides = [1, 1, 1]} : vector<4x12x16xf32> to vector<4x11x16xf32>
    %176 = tpu.concatenate %175, %171 in 1 : vector<4x11x16xf32>, vector<4x1x16xf32> -> vector<4x12x16xf32>
    %c0_86 = arith.constant 0 : index
    %c0_87 = arith.constant 0 : index
    %c0_88 = arith.constant 0 : index
    %c0_89 = arith.constant 0 : index
    %177 = vector.load %arg7[%c0_86, %c0_87, %c0_88, %c0_89] : memref<9x4x1x1xf32, #tpu.memory_space<vmem>>, vector<1x4x1x1xf32>
    %178 = vector.shape_cast %177 : vector<1x4x1x1xf32> to vector<4x1x1xf32>
    %179 = vector.broadcast %178 : vector<4x1x1xf32> to vector<4x12x16xf32>
    %180 = arith.mulf %174, %179 : vector<4x12x16xf32>
    %c3_90 = arith.constant 3 : index
    %c0_91 = arith.constant 0 : index
    %c0_92 = arith.constant 0 : index
    %c0_93 = arith.constant 0 : index
    %181 = vector.load %arg7[%c3_90, %c0_91, %c0_92, %c0_93] : memref<9x4x1x1xf32, #tpu.memory_space<vmem>>, vector<1x4x1x1xf32>
    %182 = vector.shape_cast %181 : vector<1x4x1x1xf32> to vector<4x1x1xf32>
    %183 = vector.broadcast %182 : vector<4x1x1xf32> to vector<4x12x16xf32>
    %184 = arith.mulf %170, %183 : vector<4x12x16xf32>
    %185 = arith.addf %180, %184 : vector<4x12x16xf32>
    %c6_94 = arith.constant 6 : index
    %c0_95 = arith.constant 0 : index
    %c0_96 = arith.constant 0 : index
    %c0_97 = arith.constant 0 : index
    %186 = vector.load %arg7[%c6_94, %c0_95, %c0_96, %c0_97] : memref<9x4x1x1xf32, #tpu.memory_space<vmem>>, vector<1x4x1x1xf32>
    %187 = vector.shape_cast %186 : vector<1x4x1x1xf32> to vector<4x1x1xf32>
    %188 = vector.broadcast %187 : vector<4x1x1xf32> to vector<4x12x16xf32>
    %189 = arith.mulf %176, %188 : vector<4x12x16xf32>
    %190 = arith.addf %185, %189 : vector<4x12x16xf32>
    %191 = vector.extract_strided_slice %190 {offsets = [0, 0, 0], sizes = [4, 12, 15], strides = [1, 1, 1]} : vector<4x12x16xf32> to vector<4x12x15xf32>
    %192 = tpu.concatenate %172, %191 in 2 : vector<4x12x1xf32>, vector<4x12x15xf32> -> vector<4x12x16xf32>
    %c1_98 = arith.constant 1 : index
    %c0_99 = arith.constant 0 : index
    %c0_100 = arith.constant 0 : index
    %c0_101 = arith.constant 0 : index
    %193 = vector.load %arg7[%c1_98, %c0_99, %c0_100, %c0_101] : memref<9x4x1x1xf32, #tpu.memory_space<vmem>>, vector<1x4x1x1xf32>
    %194 = vector.shape_cast %193 : vector<1x4x1x1xf32> to vector<4x1x1xf32>
    %195 = vector.broadcast %194 : vector<4x1x1xf32> to vector<4x12x16xf32>
    %196 = arith.mulf %174, %195 : vector<4x12x16xf32>
    %c4_102 = arith.constant 4 : index
    %c0_103 = arith.constant 0 : index
    %c0_104 = arith.constant 0 : index
    %c0_105 = arith.constant 0 : index
    %197 = vector.load %arg7[%c4_102, %c0_103, %c0_104, %c0_105] : memref<9x4x1x1xf32, #tpu.memory_space<vmem>>, vector<1x4x1x1xf32>
    %198 = vector.shape_cast %197 : vector<1x4x1x1xf32> to vector<4x1x1xf32>
    %199 = vector.broadcast %198 : vector<4x1x1xf32> to vector<4x12x16xf32>
    %200 = arith.mulf %170, %199 : vector<4x12x16xf32>
    %201 = arith.addf %196, %200 : vector<4x12x16xf32>
    %c7_106 = arith.constant 7 : index
    %c0_107 = arith.constant 0 : index
    %c0_108 = arith.constant 0 : index
    %c0_109 = arith.constant 0 : index
    %202 = vector.load %arg7[%c7_106, %c0_107, %c0_108, %c0_109] : memref<9x4x1x1xf32, #tpu.memory_space<vmem>>, vector<1x4x1x1xf32>
    %203 = vector.shape_cast %202 : vector<1x4x1x1xf32> to vector<4x1x1xf32>
    %204 = vector.broadcast %203 : vector<4x1x1xf32> to vector<4x12x16xf32>
    %205 = arith.mulf %176, %204 : vector<4x12x16xf32>
    %206 = arith.addf %201, %205 : vector<4x12x16xf32>
    %207 = arith.addf %192, %206 : vector<4x12x16xf32>
    %c2_110 = arith.constant 2 : index
    %c0_111 = arith.constant 0 : index
    %c0_112 = arith.constant 0 : index
    %c0_113 = arith.constant 0 : index
    %208 = vector.load %arg7[%c2_110, %c0_111, %c0_112, %c0_113] : memref<9x4x1x1xf32, #tpu.memory_space<vmem>>, vector<1x4x1x1xf32>
    %209 = vector.shape_cast %208 : vector<1x4x1x1xf32> to vector<4x1x1xf32>
    %210 = vector.broadcast %209 : vector<4x1x1xf32> to vector<4x12x16xf32>
    %211 = arith.mulf %174, %210 : vector<4x12x16xf32>
    %c5_114 = arith.constant 5 : index
    %c0_115 = arith.constant 0 : index
    %c0_116 = arith.constant 0 : index
    %c0_117 = arith.constant 0 : index
    %212 = vector.load %arg7[%c5_114, %c0_115, %c0_116, %c0_117] : memref<9x4x1x1xf32, #tpu.memory_space<vmem>>, vector<1x4x1x1xf32>
    %213 = vector.shape_cast %212 : vector<1x4x1x1xf32> to vector<4x1x1xf32>
    %214 = vector.broadcast %213 : vector<4x1x1xf32> to vector<4x12x16xf32>
    %215 = arith.mulf %170, %214 : vector<4x12x16xf32>
    %216 = arith.addf %211, %215 : vector<4x12x16xf32>
    %c8_118 = arith.constant 8 : index
    %c0_119 = arith.constant 0 : index
    %c0_120 = arith.constant 0 : index
    %c0_121 = arith.constant 0 : index
    %217 = vector.load %arg7[%c8_118, %c0_119, %c0_120, %c0_121] : memref<9x4x1x1xf32, #tpu.memory_space<vmem>>, vector<1x4x1x1xf32>
    %218 = vector.shape_cast %217 : vector<1x4x1x1xf32> to vector<4x1x1xf32>
    %219 = vector.broadcast %218 : vector<4x1x1xf32> to vector<4x12x16xf32>
    %220 = arith.mulf %176, %219 : vector<4x12x16xf32>
    %221 = arith.addf %216, %220 : vector<4x12x16xf32>
    %222 = vector.extract_strided_slice %221 {offsets = [0, 0, 1], sizes = [4, 12, 15], strides = [1, 1, 1]} : vector<4x12x16xf32> to vector<4x12x15xf32>
    %223 = tpu.concatenate %222, %172 in 2 : vector<4x12x15xf32>, vector<4x12x1xf32> -> vector<4x12x16xf32>
    %224 = arith.addf %207, %223 : vector<4x12x16xf32>
    %c0_122 = arith.constant 0 : index
    %c0_123 = arith.constant 0 : index
    %c0_124 = arith.constant 0 : index
    %225 = vector.load %arg8[%c0_122, %c0_123, %c0_124] : memref<4x1x1xf32, #tpu.memory_space<vmem>>, vector<4x1x1xf32>
    %226 = vector.broadcast %225 : vector<4x1x1xf32> to vector<4x12x16xf32>
    %227 = arith.addf %224, %226 : vector<4x12x16xf32>
    %228 = vector.extract_strided_slice %227 {offsets = [0, 2, 0], sizes = [4, 8, 16], strides = [1, 1, 1]} : vector<4x12x16xf32> to vector<4x8x16xf32>
    %229 = arith.negf %228 : vector<4x8x16xf32>
    %230 = math.exp %229 : vector<4x8x16xf32>
    %cst_125 = arith.constant 1.000000e+00 : f32
    %231 = vector.broadcast %cst_125 : f32 to vector<4x8x16xf32>
    %232 = arith.addf %231, %230 : vector<4x8x16xf32>
    %233 = arith.divf %231, %232 : vector<4x8x16xf32>
    %c0_126 = arith.constant 0 : index
    %c0_127 = arith.constant 0 : index
    %c0_128 = arith.constant 0 : index
    %c0_129 = arith.constant 0 : index
    %234 = vector.load %arg12[%c0_126, %c0_127, %c0_128, %c0_129] : memref<1x4x8x16xf32, #tpu.memory_space<vmem>>, vector<1x4x8x16xf32>
    %235 = vector.shape_cast %234 : vector<1x4x8x16xf32> to vector<4x8x16xf32>
    %236 = vector.shape_cast %233 : vector<4x8x16xf32> to vector<1x4x8x16xf32>
    tpu.vector_store %arg12[%c0_126, %c0_127, %c0_128, %c0_129], %236 {strides = array<i32>} : memref<1x4x8x16xf32, #tpu.memory_space<vmem>>, vector<1x4x8x16xf32>,
    return
  }
  func.func @transform_0(%arg0: i32, %arg1: i32) -> (i32, i32, i32, i32) {
    %c0_i32 = arith.constant 0 : i32
    %c0_i32_0 = arith.constant 0 : i32
    %c0_i32_1 = arith.constant 0 : i32
    %c0_i32_2 = arith.constant 0 : i32
    %c0_i32_3 = arith.constant 0 : i32
    return %c0_i32, %c0_i32_0, %c0_i32_1, %c0_i32_2 : i32, i32, i32, i32
  }
  func.func @transform_1(%arg0: i32, %arg1: i32) -> (i32, i32, i32) {
    %c0_i32 = arith.constant 0 : i32
    %c0_i32_0 = arith.constant 0 : i32
    %c0_i32_1 = arith.constant 0 : i32
    %c0_i32_2 = arith.constant 0 : i32
    return %c0_i32, %c0_i32_0, %c0_i32_1 : i32, i32, i32
  }
  func.func @transform_2(%arg0: i32, %arg1: i32) -> (i32, i32, i32, i32) {
    %c0_i32 = arith.constant 0 : i32
    %c0_i32_0 = arith.constant 0 : i32
    %c0_i32_1 = arith.constant 0 : i32
    %c0_i32_2 = arith.constant 0 : i32
    %c0_i32_3 = arith.constant 0 : i32
    return %c0_i32, %c0_i32_0, %c0_i32_1, %c0_i32_2 : i32, i32, i32, i32
  }
  func.func @transform_3(%arg0: i32, %arg1: i32) -> (i32, i32, i32) {
    %c0_i32 = arith.constant 0 : i32
    %c0_i32_0 = arith.constant 0 : i32
    %c0_i32_1 = arith.constant 0 : i32
    %c0_i32_2 = arith.constant 0 : i32
    return %c0_i32, %c0_i32_0, %c0_i32_1 : i32, i32, i32
  }
  func.func @transform_4(%arg0: i32, %arg1: i32) -> (i32, i32, i32, i32) {
    %c0_i32 = arith.constant 0 : i32
    %c0_i32_0 = arith.constant 0 : i32
    %c0_i32_1 = arith.constant 0 : i32
    %c0_i32_2 = arith.constant 0 : i32
    %c0_i32_3 = arith.constant 0 : i32
    return %c0_i32, %c0_i32_0, %c0_i32_1, %c0_i32_2 : i32, i32, i32, i32
  }
  func.func @transform_5(%arg0: i32, %arg1: i32) -> (i32, i32, i32, i32) {
    %c0_i32 = arith.constant 0 : i32
    %c0_i32_0 = arith.constant 0 : i32
    %c0_i32_1 = arith.constant 0 : i32
    %c0_i32_2 = arith.constant 0 : i32
    %c0_i32_3 = arith.constant 0 : i32
    return %c0_i32, %c0_i32_0, %c0_i32_1, %c0_i32_2 : i32, i32, i32, i32
  }
  func.func @transform_6(%arg0: i32, %arg1: i32) -> (i32, i32, i32) {
    %c0_i32 = arith.constant 0 : i32
    %c0_i32_0 = arith.constant 0 : i32
    %c0_i32_1 = arith.constant 0 : i32
    %c0_i32_2 = arith.constant 0 : i32
    return %c0_i32, %c0_i32_0, %c0_i32_1 : i32, i32, i32
  }
  func.func @transform_7(%arg0: i32, %arg1: i32) -> (i32, i32, i32, i32) {
    %c0_i32 = arith.constant 0 : i32
    %c0_i32_0 = arith.constant 0 : i32
    %c0_i32_1 = arith.constant 0 : i32
    return %arg0, %c0_i32, %arg1, %c0_i32_0 : i32, i32, i32, i32
  }
  func.func @transform_8(%arg0: i32, %arg1: i32) -> (i32, i32, i32, i32) {
    %c1_i32 = arith.constant 1 : i32
    %0 = arith.muli %arg1, %c1_i32 : i32
    %c1_i32_0 = arith.constant 1 : i32
    %1 = arith.subi %0, %c1_i32_0 : i32
    %c0_i32 = arith.constant 0 : i32
    %2 = arith.maxsi %1, %c0_i32 : i32
    %c0_i32_1 = arith.constant 0 : i32
    %c0_i32_2 = arith.constant 0 : i32
    %c0_i32_3 = arith.constant 0 : i32
    return %arg0, %c0_i32_1, %2, %c0_i32_2 : i32, i32, i32, i32
  }
  func.func @transform_9(%arg0: i32, %arg1: i32) -> (i32, i32, i32, i32) {
    %c1_i32 = arith.constant 1 : i32
    %0 = arith.addi %arg1, %c1_i32 : i32
    %c1_i32_0 = arith.constant 1 : i32
    %1 = arith.muli %0, %c1_i32_0 : i32
    %c1_i32_1 = arith.constant 1 : i32
    %2 = arith.minsi %1, %c1_i32_1 : i32
    %c0_i32 = arith.constant 0 : i32
    %c0_i32_2 = arith.constant 0 : i32
    %c0_i32_3 = arith.constant 0 : i32
    return %arg0, %c0_i32, %2, %c0_i32_2 : i32, i32, i32, i32
  }
  func.func @transform_10(%arg0: i32, %arg1: i32) -> (i32, i32, i32, i32) {
    %c0_i32 = arith.constant 0 : i32
    %c0_i32_0 = arith.constant 0 : i32
    %c0_i32_1 = arith.constant 0 : i32
    return %arg0, %c0_i32, %arg1, %c0_i32_0 : i32, i32, i32, i32
  }
}

</mosaic_0001>

<bundles_post_ra>
// kernel: tpu_custom_call.1
= control target key start
LH: loop header
LB: loop body
LE: loop exit
PB: predicated region body
PF: predicated region fallthrough
CT: control target
= control target key end

     0   :  { %s4804_s0 = inlined_call_operand.vmem [shape: f32[9,4,1,1], index: 0, kind: input, shape index: {}]   ;;  %s4805_s1 = inlined_call_operand.vmem [shape: f32[4,1,1], index: 1, kind: input, shape index: {}]   ;;  %s4806_s2 = inlined_call_operand.vmem [shape: f32[4,4,1,1], index: 2, kind: input, shape index: {}]   ;;  %s4807_s3 = inlined_call_operand.vmem [shape: f32[4,1,1], index: 3, kind: input, shape index: {}]   ;;  %s4808_s4 = inlined_call_operand.vmem [shape: f32[4,4,1,1], index: 4, kind: input, shape index: {}]   ;;  %s4809_s5 = inlined_call_operand.vmem [shape: f32[9,4,1,1], index: 5, kind: input, shape index: {}]   ;;  %s4810_s6 = inlined_call_operand.vmem [shape: f32[4,1,1], index: 6, kind: input, shape index: {}]   ;;  %s4811_s7 = inlined_call_operand.vmem [shape: f32[2,4,16,16], index: 7, kind: input, shape index: {}]   ;;  %s4812_s8 = inlined_call_operand.hbm [shape: f32[2,4,16,16], index: 8, kind: input, shape index: {}]   ;;  %s4813_s9 = inlined_call_operand.hbm [shape: f32[2,4,16,16], index: 9, kind: input, shape index: {}]   ;;  %s4814_s10 = inlined_call_operand.hbm [shape: f32[2,4,16,16], index: 10, kind: output, shape index: {}]  }
   0x1   :  { %4832 = sst [smem:[#allocation24_spill]] %s4808_s4 }
   0x2   :  { %4833 = sst [smem:[#allocation25_spill]] %s4809_s5 }
   0x3   :  { %4834 = sst [smem:[#allocation26_spill]] %s4810_s6 }
   0x4   :  { %4835 = sst [smem:[#allocation27_spill]] %s4811_s7 }
   0x5   :  { %4836 = sst [smem:[#allocation28_spill]] %s4812_s8 }
   0x6   :  { %4837 = sst [smem:[#allocation29_spill]] %s4814_s10 }
   0x7   :  { %15 = vsyncpa [#allocation4], 0 }
   0x8   :  { %17 = vsyncpa [#allocation4 + $0x1], 0 }
   0x9   :  { %18 = vsyncpa [#allocation7], 0 }
   0xa   :  { %20 = vsyncpa [#allocation7 + $0x1], 0 }
   0xb   :  { %21 = vsyncpa [#allocation5], 0 }
   0xc   :  { %23 = vsyncpa [#allocation5 + $0x1], 0  ;;  %s3485_s13 = smov 0   ;;  %s3487_s14 = smov 0  }
   0xd   :  { %s3489_s15 = smov 0   ;;  %s3491_s16 = smov 0  }
   0xe   :  { %s3493_s17 = smov 0   ;;  %s3495_s18 = smov 0  }
   0xf   :  { %s3497_s19 = smov 0   ;;  %s3499_s20 = smov 0  }
  0x10   :  { %s3501_s21 = smov 0   ;;  %s3503_s22 = smov 0  }
  0x11   :  { %s3505_s23 = smov 0   ;;  %s3507_s24 = smov 0  }
  0x12   :  { %s3509_s25 = smov 0   ;;  %s3511_s26 = smov 0  }
  0x13 LB: > { %4838 = sst [smem:[#allocation12_spill]] %s3363_s13  ;;  %s38_s29 = sadd.s32 1, %s3407_s24  ;;  %s3415_s26 = sphi %s3511_s26, %s29_s26   ;;  %s3411_s25 = sphi %s3509_s25, %s4895_s25   ;;  %s3407_s24 = sphi %s3507_s24, %s4883_s24   ;;  %s3403_s23 = sphi %s3505_s23, %s4894_s23   ;;  %s3399_s22 = sphi %s3503_s22, %s4882_s22   ;;  %s3395_s21 = sphi %s3501_s21, %s4881_s21   ;;  %s3391_s20 = sphi %s3499_s20, %s4893_s20   ;;  %s3387_s19 = sphi %s3497_s19, %s4892_s19   ;;  %s3383_s18 = sphi %s3495_s18, %s4891_s18   ;;  %s3379_s17 = sphi %s3493_s17, %s4890_s17   ;;  %s3375_s16 = sphi %s3491_s16, %s4889_s16   ;;  %s3371_s15 = sphi %s3489_s15, %s4888_s15   ;;  %s3367_s14 = sphi %s3487_s14, %s4887_s14   ;;  %s3363_s13 = sphi %s3485_s13, %s4886_s13  }
  0x14   : > { %4839 = sst [smem:[#allocation13_spill]] %s3387_s19  ;;  %s41_s30 = sadd.s32 1, %s3411_s25 }
  0x15   : > { %4840 = sst [smem:[#allocation14_spill]] %s3395_s21  ;;  %p39_p0 = scmp.ge.s32.totalorder %s38_s29, 2 }
  0x16   : > { %4841 = sst [smem:[#allocation15_spill]] %s3403_s23  ;;  %s197_s11 = sadd.s32 1, %s3395_s21 }
  0x17   : > { %4842 = sst [smem:[#allocation16_spill]] %s3407_s24  ;;  %p204_p1 = scmp.ne.s32.totalorder %s3395_s21, %s3391_s20 }
  0x18   : > { %p205_p2 = scmp.eq.s32.totalorder %s3415_s26, 0  ;;  %s4897_s29 = smov (%p39_p0, %s38_s29), 0 }
  0x19   : > { %4843 = sst [smem:[#allocation17_spill]] %s4897_s29  ;;  %s4899_s30 = smov (!%p39_p0, %s41_s30), %s3411_s25 }
  0x1a   : > { %s193_s12 = ssub.s32 %s3407_s24, %s4897_s29  ;;  %p3573_p3 = por %p205_p2, %p204_p1 }
  0x1b   : > { %p43_p4 = scmp.ge.s32.totalorder %s4899_s30, 2  ;;  %s231_s29 = sadd.s32 1, %s3387_s19 }
  0x1c   : > { %p238_p6 = scmp.ne.s32.totalorder %s3387_s19, %s3383_s18  ;;  %p244_p8 = scmp.ne.s32.totalorder %s3383_s18, %s3379_s17 }
  0x1d   : > { %s4901_s30 = smov (%p43_p4, %s4899_s30), 0  ;;  %s265_s5 = sadd.s32 1, %s3375_s16 }
  0x1e   : > { %4845 = sst [smem:[#allocation18_spill]] %s4901_s30  ;;  %s192_s27 = ssub.s32 %s3411_s25, %s4901_s30 }
  0x1f   : > { %s194_s10 = sor.u32 %s193_s12, %s192_s27  ;;  %p3589_p7 = por %p238_p6, %p205_p2 }
  0x20   : > { %p195_p5 = scmp.eq.s32.totalorder %s194_s10, 0  ;;  %p229_p9 = scmp.eq.s32.totalorder %s192_s27, 0 }
  0x21   : > { %s4848_s12 = sadd.s32 4294967295, %s3415_s26   ;;  %p272_p12 = scmp.ne.s32.totalorder %s3375_s16, %s3371_s15 }
  0x22   : > { %s3585_s23 = scalar_select %p195_p5, %s3395_s21, %s197_s11  }
  0x23   : > { %p245_p10 = scmp.eq.s32.totalorder %s4848_s12, 0  ;;  %p278_p13 = scmp.ne.s32.totalorder %s3371_s15, %s3367_s14 }
  0x24   : > { %4846 = sst [smem:[#allocation19_spill]] %s3585_s23  ;;  %p3611_p0 = por %p272_p12, %p205_p2 }
  0x25   : > { %s3598_s30 = scalar_select %p229_p9, %s3387_s19, %s231_s29  }
  0x26   : > { %p3600_p11 = por %p245_p10, %p244_p8  ;;  %p3615_p4 = por %p278_p13, %p245_p10 }
  0x27   : > { %4849 = sst [smem:[#allocation20_spill]] %s3598_s30  ;;  %s4853_s17 = smov %s4848_s12 }
  0x28   : > { %s4850_s10 = scalar_select %p3600_p11, 1, 0 }
  0x29   : > { %s4852_s23 = scalar_select %p3615_p4, 1, 0 }
  0x2a   : > { %p304_p5 = scmp.eq.s32.totalorder %s4853_s17, 3  ;;  %p309_p6 = scmp.ne.s32.totalorder %s3391_s20, %s3363_s13 }
  0x2b   : > { %s3624_s27 = scalar_select %p229_p9, %s3375_s16, %s265_s5  }
  0x2c   : > { %p3629_p8 = por %p304_p5, %p204_p1  ;;  %s4857_s14 = sadd.s32 4294967294, %s3415_s26  }
  0x2d   : > { %4854 = sst [smem:[#allocation21_spill]] %s3624_s27  ;;  %p310_p11 = scmp.eq.s32.totalorder %s4857_s14, 3 }
  0x2e   : > { %s4855_s29 = scalar_select %p3629_p8, 1, 0 }
  0x2f   : > { %p3635_p2 = por %p310_p11, %p309_p6  ;;  %p2769_p10 = scmp.ge.s32.totalorder %s3415_s26, 4 }
  0x30   : > { %4856 = sst [smem:[#allocation22_spill]] %s4855_s29 }
  0x31   : > { %s4858_s12 = scalar_select %p3635_p2, 1, 0 }
  0x32   : > { %347 = sbr.rel (%p2769_p10) target bundleno = 125 (0x7d), region = 44 }
  0x33   : > { %4859 = sst [smem:[#allocation23_spill]] %s4858_s12 }
  0x39   : > { %350 = sbr.rel (!%p3573_p3) target bundleno = 69 (0x45), region = 48  ;;  %s352_s5 = sand.u32 (%p3573_p3), 1, %s3395_s21  }
  0x3a   : > { %s2771_s17 = sshll.u32 (%p3573_p3), %s3411_s25, 3  ;;  %s2770_s30 = sshll.u32 (%p3573_p3), %s352_s5, 5 }
  0x3b   : > { %s356_s27 = sadd.s32 (%p3573_p3), %s3407_s24, %s2771_s17  ;;  %s4860_s7 = sld [smem:[#allocation27_spill]] (%p3573_p3) }
  0x3c   : > { %s2772_s13 = sshll.u32 (%p3573_p3), %s356_s27, 3  ;;  %s354_s12 = scalar_lea.vmem (%p3573_p3), [#allocation2], %s2770_s30 }
  0x41   : > { %s358_s4 = scalar_lea.vmem %s4860_s7, %s2772_s13 }
  0x42   : > { %v392_v0 = vld [vmem:[%s358_s4] sm:$0xff]  ;;  %v394_v1 = vld [vmem:[%s358_s4 + $0x10] sm:$0xff] }
  0x43   : > { %v396_v2 = vld [vmem:[%s358_s4 + $0x20] sm:$0xff]  ;;  %393 = vst [vmem:[%s354_s12] sm:$0xff] %v392_v0  ;;  %395 = vst [vmem:[%s354_s12 + $0x8] sm:$0xff] %v394_v1  ;;  %v398_v3 = vld [vmem:[%s358_s4 + $0x30] sm:$0xff] }
  0x44   : > { %397 = vst [vmem:[%s354_s12 + $0x10] sm:$0xff] %v396_v2  ;;  %399 = vst [vmem:[%s354_s12 + $0x18] sm:$0xff] %v398_v3 }
  0x45 PF: > { %s406_s28 = sand.u32 1, %s3387_s19   ;;  %s4826_s5 = sshll.u32 %s3411_s25, 10 }
  0x46   : > { %s2773_s27 = sshll.u32 %s406_s28, 5  ;;  %s4861_s8 = sld [smem:[#allocation28_spill]] }
  0x47   : > { %s410_s29 = scalar_lea.vmem [#allocation3], %s2773_s27  ;;  %s431_s4 = sand.u32 1, %s3375_s16  }
  0x48   : > { %s421_s13 = sshll.u32 %s410_s29, 4  ;;  %s3660_s12 = scalar_lea.sflag [#allocation4], %s406_s28  ;;  %s3657_s13 = int_to_ptr.vmem [resolvable:$true] %s421_s13 }
  0x4c   : > { %s3655_s30 = scalar_lea.hbm %s4861_s8, %s4826_s5  ;;  %s3209_s17 = scalar_lea.hbm %s4861_s8, 2048 }
  0x4d   : > { %s3205_s7 = scalar_lea.hbm %s3655_s30, 512  ;;  %p3210_p11 = scmp.lt.u32.totalorder %s3655_s30, %s4861_s8 }
  0x4e   : > { %p3206_p1 = scmp.ne.s32.totalorder %s3655_s30, %s3205_s7  ;;  %p3211_p12 = scmp.lt.u32.totalorder %s3209_s17, %s3205_s7 }
  0x4f   : > { %p3213_p5 = scmp.lt.u32.totalorder %s3205_s7, %s3655_s30 }
  0x50   : > { %p3207_p3 = pnand %p3206_p1, %p3589_p7  ;;  %p3212_p13 = por %p3211_p12, %p3210_p11 }
  0x52   : > { %p3208_p9 = pneg %p3207_p3  ;;  %p3214_p6 = por %p3213_p5, %p3212_p13 }
  0x54   : > { %p3215_p10 = pnand %p3214_p6, %p3208_p9 }
  0x56   : > { %3218 = shalt.err (!%p3215_p10)
}
  0x57   : > { %s3219_s28 = scalar_lea.vmem %s3657_s13, 512  ;;  %s3417_s27 = smov [#allocation3]  }
  0x58   : > { %p3220_p1 = scmp.ne.s32.totalorder %s3657_s13, %s3219_s28  ;;  %s3223_s29 = sshll.u32 %s3417_s27, 4  ;;  %s3224_s29 = int_to_ptr.vmem [resolvable:$false] %s3223_s29 }
  0x59   : > { %s3225_s5 = scalar_lea.vmem %s3224_s29, 1024  ;;  %p3226_p8 = scmp.lt.s32.totalorder %s3657_s13, %s3224_s29 }
  0x5a   : > { %p3221_p3 = pnand %p3220_p1, %p3589_p7  ;;  %p3227_p4 = scmp.lt.s32.totalorder %s3225_s5, %s3219_s28 }
  0x5c   : > { %p3222_p2 = pneg %p3221_p3  ;;  %p3228_p11 = por %p3227_p4, %p3226_p8 }
  0x5e   : > { %p3229_p12 = pnand %p3228_p11, %p3222_p2 }
  0x60   : > { %3232 = shalt.err (!%p3229_p12)
}
  0x61   : > { %s3418_s7 = smov 256   ;;  %s3419_s17 = smov 128  }
  0x62   : > { %s3420_s14 = smov 8   ;;  %s2777_s28 = sshll.u32 %s431_s4, 5 }
  0x63   : > { %3006 = dma.hbm_to_vmem [thread:$0]  (%p3589_p7), %s3655_s30, 512, %s3657_s13, %s3660_s12, %s3418_s7, %s3419_s17, %s3420_s14  }
  0x64   : > { %s4862_s27 = sshll.u32 %s3411_s25, 10  ;;  %s435_s5 = scalar_lea.vmem [#allocation6], %s2777_s28 }
  0x65   : > { %s3359_s29 = sadd.s32 128, %s4862_s27  ;;  %s446_s8 = sshll.u32 %s435_s5, 4  ;;  %s3696_s8 = int_to_ptr.vmem [resolvable:$true] %s446_s8 }
  0x66   : > { %s3694_s19 = scalar_lea.hbm %s4813_s9, %s3359_s29  ;;  %s3700_s6 = scalar_lea.sflag [#allocation7], %s431_s4 }
  0x67   : > { %s3233_s13 = scalar_lea.hbm %s3694_s19, 512  ;;  %s3237_s21 = scalar_lea.hbm %s4813_s9, 2048 }
  0x68   : > { %p3234_p7 = scmp.ne.s32.totalorder %s3694_s19, %s3233_s13  ;;  %p3238_p2 = scmp.lt.u32.totalorder %s3694_s19, %s4813_s9 }
  0x69   : > { %p3239_p9 = scmp.lt.u32.totalorder %s3237_s21, %s3233_s13  ;;  %p3241_p5 = scmp.lt.u32.totalorder %s3233_s13, %s3694_s19 }
  0x6a   : > { %p3235_p4 = pnand %p3234_p7, %p3611_p0 }
  0x6b   : > { %p3240_p13 = por %p3239_p9, %p3238_p2 }
  0x6c   : > { %p3236_p8 = pneg %p3235_p4 }
  0x6d   : > { %p3242_p6 = por %p3241_p5, %p3240_p13 }
  0x6f   : > { %p3243_p10 = pnand %p3242_p6, %p3236_p8 }
  0x71   : > { %3246 = shalt.err (!%p3243_p10)
}
  0x72   : > { %s3247_s4 = scalar_lea.vmem %s3696_s8, 512  ;;  %s3421_s27 = smov [#allocation6]  }
  0x73   : > { %p3248_p1 = scmp.ne.s32.totalorder %s3696_s8, %s3247_s4  ;;  %s3251_s29 = sshll.u32 %s3421_s27, 4  ;;  %s3252_s29 = int_to_ptr.vmem [resolvable:$false] %s3251_s29 }
  0x74   : > { %s3253_s5 = scalar_lea.vmem %s3252_s29, 1024  ;;  %p3254_p12 = scmp.lt.s32.totalorder %s3696_s8, %s3252_s29 }
  0x75   : > { %p3249_p3 = pnand %p3248_p1, %p3611_p0  ;;  %p3255_p7 = scmp.lt.s32.totalorder %s3253_s5, %s3247_s4 }
  0x77   : > { %p3250_p11 = pneg %p3249_p3  ;;  %p3256_p4 = por %p3255_p7, %p3254_p12 }
  0x79   : > { %p3257_p2 = pnand %p3256_p4, %p3250_p11 }
  0x7b   : > { %3260 = shalt.err (!%p3257_p2)
}
  0x7c   : > { %3007 = dma.hbm_to_vmem [thread:$0]  (%p3611_p0), %s3694_s19, 512, %s3696_s8, %s3700_s6, %s3418_s7, %s3419_s17, %s3420_s14  }
  0x7d PF: > { %p2780_p8 = scmp.ge.s32.totalorder %s3415_s26, 1  ;;  %p454_p9 = scmp.lt.s32.totalorder %s3415_s26, 5 }
  0x7f   : > { %p455_p13 = pnand %p2780_p8, %p454_p9 }
  0x80   : > { %s461_s13 = sand.u32 (!%p455_p13), 1, %s3391_s20   ;;  %s467_s11 = sand.u32 (!%p455_p13), 1, %s3383_s18  }
  0x81   : > { %458 = sbr.rel (%p455_p13) target bundleno = 748 (0x2ec), region = 94  ;;  %s3733_s30 = sshll.u32 (!%p455_p13), %s461_s13, 5 }
  0x82   : > { %s2782_s12 = sshll.u32 (!%p455_p13), %s467_s11, 5  ;;  %s3736_s21 = scalar_lea.vmem (!%p455_p13), [#allocation2], %s3733_s30 }
  0x83   : > { %s468_s8 = scalar_lea.sflag (!%p455_p13), [#allocation4], %s467_s11  ;;  %s3738_s19 = scalar_lea.vmem (!%p455_p13), [#allocation3], %s2782_s12 }
  0x84   : > { %p4863_p0 = scmp.ne.s32.totalorder (!%p455_p13), %s4850_s10, 0 }
  0x88   : > { %3346 = dma.done.wait (%p4863_p0), %s468_s8, 512  }
  0x89   : > { %3348 = vsyncadd (%p4863_p0), %s468_s8, 4294966784  ;;  %s476_s7 = sand.u32 1, %s3371_s15   ;;  %p4864_p5 = scmp.ne.s32.totalorder %s4852_s23, 0 }
  0x8a   : > { %s2783_s17 = sshll.u32 %s476_s7, 5  ;;  %s477_s14 = scalar_lea.sflag [#allocation7], %s476_s7 }
  0x8b   : > { %s3745_s6 = scalar_lea.vmem [#allocation6], %s2783_s17 }
  0x8c   : > { %3350 = dma.done.wait (%p4864_p5), %s477_s14, 512  }
  0x8d   : > { %3352 = vsyncadd (%p4864_p5), %s477_s14, 4294966784  ;;  %v3422_v4 = vmov 0   ;;  %v2791_v5 = vld [vmem:[%s4804_s0 + $0x2] ss:$0 sm:$0xff]  ;;  %v2789_v6 = vld [vmem:[%s4804_s0] ss:$0 sm:$0xff]  ;;  %v577_v61 = vlaneseq }
  0x8e   : > { %3140 = vset.pattern.permute.xlu1 %v3422_v4  ;;  %3139 = vset.pattern.permute.xlu0 %v3422_v4  ;;  %v2792_v7 = vld [vmem:[%s4804_s0 + $0x3] ss:$0 sm:$0xff]  ;;  %v2790_v8 = vld [vmem:[%s4804_s0 + $0x1] ss:$0 sm:$0xff]  ;;  %v2798_v9 = vld [vmem:[%s4804_s0 + $0xd] ss:$0 sm:$0xff] }
  0x8f   : > { %695 = vperm.xlu1 %3140, %v2791_v5   ;;  %687 = vperm.xlu0 %3139, %v2789_v6   ;;  %v2797_v10 = vld [vmem:[%s4804_s0 + $0xc] ss:$0 sm:$0xff]  ;;  %v2800_v11 = vld [vmem:[%s4804_s0 + $0xf] ss:$0 sm:$0xff]  ;;  %v2799_v12 = vld [vmem:[%s4804_s0 + $0xe] ss:$0 sm:$0xff] }
  0x90   : > { %v2806_v13 = vld [vmem:[%s4804_s0 + $0x19] ss:$0 sm:$0xff]  ;;  %v2805_v14 = vld [vmem:[%s4804_s0 + $0x18] ss:$0 sm:$0xff]  ;;  %v2808_v15 = vld [vmem:[%s4804_s0 + $0x1b] ss:$0 sm:$0xff] }
  0x91   : > { %v2807_v16 = vld [vmem:[%s4804_s0 + $0x1a] ss:$0 sm:$0xff]  ;;  %v2814_v17 = vld [vmem:[%s4804_s0 + $0x5] ss:$0 sm:$0xff]  ;;  %v2813_v18 = vld [vmem:[%s4804_s0 + $0x4] ss:$0 sm:$0xff] }
  0x92   : > { %v2816_v19 = vld [vmem:[%s4804_s0 + $0x7] ss:$0 sm:$0xff]  ;;  %v2815_v20 = vld [vmem:[%s4804_s0 + $0x6] ss:$0 sm:$0xff]  ;;  %v2822_v21 = vld [vmem:[%s4804_s0 + $0x11] ss:$0 sm:$0xff] }
  0x93   : > { %699 = vperm.xlu1 %3140, %v2792_v7   ;;  %691 = vperm.xlu0 %3139, %v2790_v8   ;;  %v2821_v22 = vld [vmem:[%s4804_s0 + $0x10] ss:$0 sm:$0xff]  ;;  %v2824_v23 = vld [vmem:[%s4804_s0 + $0x13] ss:$0 sm:$0xff]  ;;  %v2823_v24 = vld [vmem:[%s4804_s0 + $0x12] ss:$0 sm:$0xff] }
  0x94   : > { %v2830_v25 = vld [vmem:[%s4804_s0 + $0x1d] ss:$0 sm:$0xff]  ;;  %v2829_v26 = vld [vmem:[%s4804_s0 + $0x1c] ss:$0 sm:$0xff]  ;;  %v2832_v27 = vld [vmem:[%s4804_s0 + $0x1f] ss:$0 sm:$0xff] }
  0x95   : > { %v2831_v28 = vld [vmem:[%s4804_s0 + $0x1e] ss:$0 sm:$0xff]  ;;  %v2838_v29 = vld [vmem:[%s4804_s0 + $0x9] ss:$0 sm:$0xff]  ;;  %v2837_v30 = vld [vmem:[%s4804_s0 + $0x8] ss:$0 sm:$0xff] }
  0x96   : > { %v2840_v31 = vld [vmem:[%s4804_s0 + $0xb] ss:$0 sm:$0xff]  ;;  %v2839_v32 = vld [vmem:[%s4804_s0 + $0xa] ss:$0 sm:$0xff]  ;;  %v2846_v33 = vld [vmem:[%s4804_s0 + $0x15] ss:$0 sm:$0xff] }
  0x97   : > { %740 = vperm.xlu1 %3140, %v2798_v9   ;;  %736 = vperm.xlu0 %3139, %v2797_v10   ;;  %v2845_v34 = vld [vmem:[%s4804_s0 + $0x14] ss:$0 sm:$0xff]  ;;  %v2848_v35 = vld [vmem:[%s4804_s0 + $0x17] ss:$0 sm:$0xff]  ;;  %v2847_v36 = vld [vmem:[%s4804_s0 + $0x16] ss:$0 sm:$0xff] }
  0x98   : > { %v2854_v37 = vld [vmem:[%s4804_s0 + $0x21] ss:$0 sm:$0xff]  ;;  %v2853_v38 = vld [vmem:[%s4804_s0 + $0x20] ss:$0 sm:$0xff]  ;;  %v2856_v39 = vld [vmem:[%s4804_s0 + $0x23] ss:$0 sm:$0xff] }
  0x99   : > { %v2855_v40 = vld [vmem:[%s4804_s0 + $0x22] ss:$0 sm:$0xff]  ;;  %v2858_v41 = vld [vmem:[%s4805_s1 + $0x1] ss:$0 sm:$0xff]  ;;  %v2857_v42 = vld [vmem:[%s4805_s1] ss:$0 sm:$0xff] }
  0x9a   : > { %v2860_v43 = vld [vmem:[%s4805_s1 + $0x3] ss:$0 sm:$0xff]  ;;  %v2859_v44 = vld [vmem:[%s4805_s1 + $0x2] ss:$0 sm:$0xff]  ;;  %v2862_v45 = vld [vmem:[%s4806_s2 + $0x1] ss:$0 sm:$0xff] }
  0x9b   : > { %748 = vperm.xlu1 %3140, %v2800_v11   ;;  %744 = vperm.xlu0 %3139, %v2799_v12   ;;  %v2861_v46 = vld [vmem:[%s4806_s2] ss:$0 sm:$0xff]  ;;  %v2864_v47 = vld [vmem:[%s4806_s2 + $0x3] ss:$0 sm:$0xff]  ;;  %v2863_v48 = vld [vmem:[%s4806_s2 + $0x2] ss:$0 sm:$0xff] }
  0x9c   : > { %v2870_v49 = vld [vmem:[%s4806_s2 + $0x5] ss:$0 sm:$0xff]  ;;  %v2869_v50 = vld [vmem:[%s4806_s2 + $0x4] ss:$0 sm:$0xff]  ;;  %v2872_v51 = vld [vmem:[%s4806_s2 + $0x7] ss:$0 sm:$0xff] }
  0x9d   : > { %v2871_v52 = vld [vmem:[%s4806_s2 + $0x6] ss:$0 sm:$0xff]  ;;  %v2878_v53 = vld [vmem:[%s4806_s2 + $0x9] ss:$0 sm:$0xff]  ;;  %v2877_v54 = vld [vmem:[%s4806_s2 + $0x8] ss:$0 sm:$0xff] }
  0x9e   : > { %v2880_v55 = vld [vmem:[%s4806_s2 + $0xb] ss:$0 sm:$0xff]  ;;  %v2879_v56 = vld [vmem:[%s4806_s2 + $0xa] ss:$0 sm:$0xff]  ;;  %v2886_v57 = vld [vmem:[%s4806_s2 + $0xd] ss:$0 sm:$0xff] }
  0x9f   : > { %797 = vperm.xlu1 %3140, %v2806_v13   ;;  %793 = vperm.xlu0 %3139, %v2805_v14   ;;  %v2885_v58 = vld [vmem:[%s4806_s2 + $0xc] ss:$0 sm:$0xff]  ;;  %v2888_v59 = vld [vmem:[%s4806_s2 + $0xf] ss:$0 sm:$0xff]  ;;  %v2887_v60 = vld [vmem:[%s4806_s2 + $0xe] ss:$0 sm:$0xff] }
  0xa0   : > { %s2785_s24 = sshll.u32 %s3399_s22, 3  ;;  %v578_v62 = vshrl.u32 %v577_v61, 7  ;;  %v536_v3 = vld [vmem:[%s3736_s21] sm:$0xff]  ;;  %v538_v5 = vld [vmem:[%s3736_s21 + $0x10] sm:$0xff]  ;;  %v537_v8 = vld [vmem:[%s3736_s21 + $0x8] sm:$0xff]  ;;  %vm568_vm5 = vcmask 1041408  }
  0xa1   : > { %s2786_s28 = sadd.s32 4294967294, %s2785_s24  ;;  %v540_v4 = vld [vmem:[%s3745_s6] sm:$0x3]  ;;  %v548_v6 = vrot.slane %v536_v3, 6  ;;  %v542_v9 = vld [vmem:[%s3745_s6 + $0x10] sm:$0x3] }
  0xa2   : > { %v579_v63 = vadd.s32 8, %v578_v62  ;;  %v582_v0 = vstv %s2786_s28  ;;  %v560_v7 = vrot.slane %v540_v4, 6  ;;  %v532_v10 = vld [vmem:[%s3738_s19 + $0x6] sm:$0x3]  ;;  %v550_v11 = vrot.slane %v538_v5, 6  ;;  %s4865_s7 = sld [smem:[#allocation24_spill]] }
  0xa3   : > { %805 = vperm.xlu1 %3140, %v2808_v15   ;;  %801 = vperm.xlu0 %3139, %v2807_v16   ;;  %v583_v1 = vadd.s32 %v582_v0, %v578_v62  ;;  %v541_v12 = vld [vmem:[%s3745_s6 + $0x8] sm:$0x3]  ;;  %v3423_v13 = vmov 0.0   ;;  %v534_v15 = vld [vmem:[%s3738_s19 + $0x16] sm:$0x3]  ;;  %v549_v16 = vrot.slane %v537_v8, 6 }
  0xa4   : > { %v584_v2 = vadd.s32 %v582_v0, %v579_v63  ;;  %vm611_vm7 = vcmask 1040384   ;;  %vm636_vm8 = vcmask 1046528   ;;  %vm657_vm9 = vcmask 1042432   ;;  %s4867_s12 = sld [smem:[#allocation26_spill]]  ;;  %s4869_s29 = sld [smem:[#allocation22_spill]] }
  0xa5   : > { %vm585_vm0 = vcmp.ge.s32.totalorder %v583_v1, 0  ;;  %vm587_vm1 = vcmp.lt.s32.totalorder %v583_v1, 16  ;;  %vm856_vm10 = vcmask 7168   ;;  %vm1231_vm11 = vcmask 121856   ;;  %s4728_s14 = scalar_lea.sflag [#allocation5], %s461_s13  ;;  %s3426_s28 = smov [#allocation8]  }
  0xa6   : > { %vm586_vm2 = vcmp.ge.s32.totalorder %v584_v2, 0  ;;  %vm588_vm3 = vcmp.lt.s32.totalorder %v584_v2, 16  ;;  %vm589_vm4 = vmand %vm585_vm0, %vm587_vm1  ;;  %vm2606_vm12 = vcmask 130050   ;;  %vm2608_vm13 = vcmask 123904   ;;  %s3265_s10 = sshll.u32 %s3426_s28, 4  ;;  %s3266_s10 = int_to_ptr.vmem [resolvable:$false] %s3265_s10 }
  0xa7   : > { %895 = vperm.xlu1 %3140, %v2814_v17   ;;  %891 = vperm.xlu0 %3139, %v2813_v18   ;;  %vm590_vm6 = vmand %vm586_vm2, %vm588_vm3  ;;  %v3927_v14 = vsel %vm589_vm4, 1.0, %v3423_v13 }
  0xa8   : > { %v3930_v17 = vsel %vm590_vm6, 1.0, %v3423_v13 }
  0xaa   : > { %p4872_p10 = scmp.ne.s32.totalorder %s4869_s29, 0 }
  0xab   : > { %903 = vperm.xlu1 %3140, %v2816_v19   ;;  %899 = vperm.xlu0 %3139, %v2815_v20   ;;  %v562_v19 = vrot.slane %v542_v9, 6 }
  0xaf   : > { %944 = vperm.xlu1 %3140, %v2822_v21   ;;  %940 = vperm.xlu0 %3139, %v2821_v22   ;;  %v569_v21 = vsel %vm568_vm5, %v532_v10, %v548_v6  ;;  %v573_v22 = vsel %vm568_vm5, %v548_v6, %v560_v7 }
  0xb3   : > { %952 = vperm.xlu1 %3140, %v2824_v23   ;;  %948 = vperm.xlu0 %3139, %v2823_v24   ;;  %v533_v23 = vld [vmem:[%s3738_s19 + $0xe] sm:$0x3]  ;;  %v561_v24 = vrot.slane %v541_v12, 6 }
  0xb7   : > { %1001 = vperm.xlu1 %3140, %v2830_v25   ;;  %997 = vperm.xlu0 %3139, %v2829_v26   ;;  %v571_v25 = vsel %vm568_vm5, %v534_v15, %v550_v11  ;;  %v3939_v26 = vmul.f32 %v3927_v14, %v569_v21 }
  0xbb   : > { %1009 = vperm.xlu1 %3140, %v2832_v27   ;;  %1005 = vperm.xlu0 %3139, %v2831_v28   ;;  %v3942_v27 = vmul.f32 %v3930_v17, %v573_v22  ;;  %v539_v28 = vld [vmem:[%s3736_s21 + $0x18] sm:$0xff]  ;;  %s3424_s21 = smov 1  }
  0xbf   : > { %1066 = vperm.xlu1 %3140, %v2838_v29   ;;  %1062 = vperm.xlu0 %3139, %v2837_v30   ;;  %v570_v29 = vsel %vm568_vm5, %v533_v23, %v549_v16  ;;  %v575_v30 = vsel %vm568_vm5, %v550_v11, %v562_v19 }
  0xc3   : > { %1074 = vperm.xlu1 %3140, %v2840_v31   ;;  %1070 = vperm.xlu0 %3139, %v2839_v32   ;;  %v543_v32 = vld [vmem:[%s3745_s6 + $0x18] sm:$0x3]  ;;  %s4866_s6 = sld [smem:[#allocation25_spill]] }
  0xc7   : > { %1115 = vperm.xlu1 %3140, %v2846_v33   ;;  %1111 = vperm.xlu0 %3139, %v2845_v34   ;;  %v3951_v34 = vmul.f32 %v3927_v14, %v571_v25 }
  0xc9   : > { %v643_v6 = vrot.slane %v3951_v34, 1 }
  0xcb   : > { %1123 = vperm.xlu1 %3140, %v2848_v35   ;;  %1119 = vperm.xlu0 %3139, %v2847_v36   ;;  %v574_v35 = vsel %vm568_vm5, %v549_v16, %v561_v24  ;;  %v551_v36 = vrot.slane %v539_v28, 6 }
  0xcf   : > { %1172 = vperm.xlu1 %3140, %v2854_v37   ;;  %1168 = vperm.xlu0 %3139, %v2853_v38   ;;  %v3955_v37 = vmul.f32 %v3927_v14, %v570_v29  ;;  %v3958_v38 = vmul.f32 %v3930_v17, %v575_v30 }
  0xd1   : > { %v644_v7 = vrot.slane %v3958_v38, 1 }
  0xd3   : > { %1180 = vperm.xlu1 %3140, %v2856_v39   ;;  %1176 = vperm.xlu0 %3139, %v2855_v40   ;;  %v612_v39 = vrot.slane %v3939_v26, 7  ;;  %v613_v40 = vrot.slane %v3942_v27, 7 }
  0xd7   : > { %1277 = vperm.xlu1 %3140, %v2858_v41   ;;  %1273 = vperm.xlu0 %3139, %v2857_v42   ;;  %v535_v41 = vld [vmem:[%s3738_s19 + $0x1e] sm:$0x3]  ;;  %v563_v42 = vrot.slane %v543_v32, 6  ;;  %s3425_s19 = smov 127  }
  0xdb   : > { %1285 = vperm.xlu1 %3140, %v2860_v43   ;;  %1281 = vperm.xlu0 %3139, %v2859_v44   ;;  %v3964_v43 = vmul.f32 %v3930_v17, %v574_v35 }
  0xdf   : > { %1329 = vperm.xlu1 %3140, %v2862_v45   ;;  %1325 = vperm.xlu0 %3139, %v2861_v46   ;;  %v618_v46 = vrot.slane %v3951_v34, 7 }
  0xe3   : > { %1337 = vperm.xlu1 %3140, %v2864_v47   ;;  %1333 = vperm.xlu0 %3139, %v2863_v48   ;;  %v572_v47 = vsel %vm568_vm5, %v535_v41, %v551_v36  ;;  %v615_v48 = vrot.slane %v3955_v37, 7  ;;  %v4032_v41 = vsel %vm636_vm8, %v643_v6, %v644_v7 }
  0xe4   : > { %v3988_v61 = vmul.f32 %v3927_v14, %v572_v47 }
  0xe5   : > { %v3996_v1 = vsel %vm611_vm7, 0.0, %v615_v48 }
  0xe6   : > { %v621_v22 = vrot.slane %v3988_v61, 7  ;;  %v646_v24 = vrot.slane %v3988_v61, 1 }
  0xe7   : > { %1378 = vperm.xlu1 %3140, %v2870_v49   ;;  %1374 = vperm.xlu0 %3139, %v2869_v50   ;;  %v637_v49 = vrot.slane %v3939_v26, 1  ;;  %v638_v50 = vrot.slane %v3942_v27, 1 }
  0xe9   : > { %v3999_v2 = vsel %vm636_vm8, %v637_v49, %v638_v50  ;;  %v4002_v3 = vsel %vm657_vm9, %v638_v50, 0.0  ;;  %v4045_v49 = vsel %vm611_vm7, 0.0, %v621_v22 }
  0xeb   : > { %1386 = vperm.xlu1 %3140, %v2872_v51   ;;  %1382 = vperm.xlu0 %3139, %v2871_v52   ;;  %v619_v51 = vrot.slane %v3958_v38, 7  ;;  %v3973_v52 = vsel %vm611_vm7, %v612_v39, %v613_v40 }
  0xed   : > { %v4021_v21 = vsel %vm611_vm7, %v618_v46, %v619_v51 }
  0xef   : > { %1435 = vperm.xlu1 %3140, %v2878_v53   ;;  %1431 = vperm.xlu0 %3139, %v2877_v54   ;;  %v576_v53 = vsel %vm568_vm5, %v551_v36, %v563_v42  ;;  %v3977_v54 = vsel %vm611_vm7, 0.0, %v612_v39 }
  0xf0   : > { %v3993_v0 = vmul.f32 %v3930_v17, %v576_v53 }
  0xf2   : > { %v647_v39 = vrot.slane %v3993_v0, 1  ;;  %v622_v42 = vrot.slane %v3993_v0, 7 }
  0xf3   : > { %1443 = vperm.xlu1 %3140, %v2880_v55   ;;  %1439 = vperm.xlu0 %3139, %v2879_v56   ;;  %v616_v55 = vrot.slane %v3964_v43, 7 }
  0xf4   : > { %v4060_v6 = vsel %vm657_vm9, %v647_v39, 0.0 }
  0xf5   : > { %v4009_v8 = vsel %vm611_vm7, %v615_v48, %v616_v55  ;;  %v4051_v55 = vsel %vm636_vm8, %v646_v24, %v647_v39 }
  0xf7   : > { %1492 = vperm.xlu1 %3140, %v2886_v57   ;;  %1488 = vperm.xlu0 %3139, %v2885_v58   ;;  %v640_v58 = vrot.slane %v3955_v37, 1 }
  0xfb   : > { %1500 = vperm.xlu1 %3140, %v2888_v59   ;;  %1496 = vperm.xlu0 %3139, %v2887_v60   ;;  %v641_v59 = vrot.slane %v3964_v43, 1  ;;  %v3985_v60 = vsel %vm611_vm7, 0.0, %v618_v46  ;;  %v4037_v46 = vsel %vm657_vm9, %v644_v7, 0.0 }
  0xfd   : > { %v4013_v11 = vsel %vm636_vm8, %v640_v58, %v641_v59  ;;  %v4016_v12 = vsel %vm657_vm9, %v641_v59, 0.0 }
 0x10e   : > { %v3932_v18 = vpop.permute.xlu1 %695  ;;  %v688_v20 = vpop.permute.xlu0 %687 }
 0x10f   : > { %v702_v4 = vmul.f32 %v688_v20, %v3977_v54  ;;  %v703_v5 = vmul.f32 %v688_v20, %v3973_v52  ;;  %v706_v48 = vmul.f32 %v3932_v18, %v3985_v60  ;;  %v707_v53 = vmul.f32 %v3932_v18, %v4021_v21 }
 0x112   : > { %v3947_v31 = vpop.permute.xlu1 %699  ;;  %v692_v33 = vpop.permute.xlu0 %691 }
 0x113   : > { %v704_v25 = vmul.f32 %v692_v33, %v3996_v1  ;;  %v705_v32 = vmul.f32 %v692_v33, %v4009_v8 }
 0x116   : > { %v741_v44 = vpop.permute.xlu1 %740  ;;  %v737_v45 = vpop.permute.xlu0 %736 }
 0x117   : > { %v751_v62 = vmul.f32 %v737_v45, %v3939_v26  ;;  %v752_v63 = vmul.f32 %v737_v45, %v3942_v27  ;;  %v753_v9 = vmul.f32 %v741_v44, %v3955_v37  ;;  %v754_v23 = vmul.f32 %v741_v44, %v3964_v43 }
 0x119   : > { %v759_v15 = vadd.f32 %v751_v62, %v702_v4  ;;  %v760_v16 = vadd.f32 %v752_v63, %v703_v5  ;;  %v761_v44 = vadd.f32 %v753_v9, %v704_v25  ;;  %v762_v33 = vadd.f32 %v754_v23, %v705_v32 }
 0x11a   : > { %v3980_v56 = vpop.permute.xlu1 %748  ;;  %v745_v57 = vpop.permute.xlu0 %744  ;;  %v4055_v63 = vsel %vm611_vm7, %v621_v22, %v622_v42  ;;  %v708_v9 = vmul.f32 %v3947_v31, %v4045_v49 }
 0x11b   : > { %v755_v45 = vmul.f32 %v745_v57, %v3951_v34  ;;  %v756_v47 = vmul.f32 %v745_v57, %v3958_v38  ;;  %v757_v4 = vmul.f32 %v3980_v56, %v3988_v61  ;;  %v758_v18 = vmul.f32 %v3980_v56, %v3993_v0 }
 0x11d   : > { %v763_v5 = vadd.f32 %v755_v45, %v706_v48  ;;  %v764_v7 = vadd.f32 %v756_v47, %v707_v53  ;;  %v765_v23 = vadd.f32 %v757_v4, %v708_v9 }
 0x11e   : > { %v798_v10 = vpop.permute.xlu1 %797  ;;  %v794_v13 = vpop.permute.xlu0 %793 }
 0x11f   : > { %v808_v19 = vmul.f32 %v794_v13, %v3999_v2  ;;  %v809_v20 = vmul.f32 %v794_v13, %v4002_v3  ;;  %v810_v28 = vmul.f32 %v798_v10, %v4013_v11  ;;  %v811_v35 = vmul.f32 %v798_v10, %v4016_v12 }
 0x121   : > { %v816_v29 = vadd.f32 %v808_v19, %v759_v15  ;;  %v817_v30 = vadd.f32 %v809_v20, %v760_v16  ;;  %v818_v51 = vadd.f32 %v810_v28, %v761_v44  ;;  %v819_v62 = vadd.f32 %v811_v35, %v762_v33 }
 0x122   : > { %v806_v36 = vpop.permute.xlu1 %805  ;;  %v802_v40 = vpop.permute.xlu0 %801  ;;  %v709_v15 = vmul.f32 %v3947_v31, %v4055_v63 }
 0x123   : > { %832 = vrot.lane.b32.xlu0 %v816_v29, %s3424_s21  ;;  %834 = vrot.lane.b32.xlu1 %v817_v30, %s3424_s21  ;;  %v812_v50 = vmul.f32 %v802_v40, %v4032_v41  ;;  %v813_v58 = vmul.f32 %v802_v40, %v4037_v46  ;;  %v814_v10 = vmul.f32 %v806_v36, %v4051_v55 }
 0x124   : > { %v815_v16 = vmul.f32 %v806_v36, %v4060_v6  ;;  %v766_v56 = vadd.f32 %v758_v18, %v709_v15 }
 0x125   : > { %v820_v13 = vadd.f32 %v812_v50, %v763_v5  ;;  %v821_v22 = vadd.f32 %v813_v58, %v764_v7  ;;  %v822_v24 = vadd.f32 %v814_v10, %v765_v23 }
 0x126   : > { %v896_v57 = vpop.permute.xlu1 %895  ;;  %v892_v59 = vpop.permute.xlu0 %891  ;;  %v823_v29 = vadd.f32 %v815_v16, %v766_v56 }
 0x127   : > { %836 = vrot.lane.b32.xlu0 %v818_v51, %s3424_s21  ;;  %838 = vrot.lane.b32.xlu1 %v819_v62, %s3424_s21  ;;  %v908_v40 = vmul.f32 %v896_v57, %v3996_v1  ;;  %v909_v42 = vmul.f32 %v896_v57, %v4009_v8  ;;  %v906_v44 = vmul.f32 %v892_v59, %v3977_v54 }
 0x128   : > { %v907_v45 = vmul.f32 %v892_v59, %v3973_v52 }
 0x12a   : > { %v904_v19 = vpop.permute.xlu1 %903  ;;  %v900_v20 = vpop.permute.xlu0 %899 }
 0x12b   : > { %840 = vrot.lane.b32.xlu0 %v820_v13, %s3424_s21  ;;  %842 = vrot.lane.b32.xlu1 %v821_v22, %s3424_s21  ;;  %v912_v9 = vmul.f32 %v904_v19, %v4045_v49  ;;  %v913_v10 = vmul.f32 %v904_v19, %v4055_v63  ;;  %v910_v13 = vmul.f32 %v900_v20, %v3985_v60 }
 0x12c   : > { %v911_v15 = vmul.f32 %v900_v20, %v4021_v21 }
 0x12e   : > { %v945_v25 = vpop.permute.xlu1 %944  ;;  %v941_v28 = vpop.permute.xlu0 %940 }
 0x12f   : > { %844 = vrot.lane.b32.xlu0 %v822_v24, %s3424_s21  ;;  %846 = vrot.lane.b32.xlu1 %v823_v29, %s3424_s21  ;;  %v957_v31 = vmul.f32 %v945_v25, %v3955_v37  ;;  %v958_v30 = vmul.f32 %v945_v25, %v3964_v43  ;;  %v955_v32 = vmul.f32 %v941_v28, %v3939_v26 }
 0x130   : > { %v956_v35 = vmul.f32 %v941_v28, %v3942_v27 }
 0x131   : > { %v963_v33 = vadd.f32 %v955_v32, %v906_v44  ;;  %v965_v48 = vadd.f32 %v957_v31, %v908_v40  ;;  %v966_v50 = vadd.f32 %v958_v30, %v909_v42 }
 0x132   : > { %v953_v36 = vpop.permute.xlu1 %952  ;;  %v949_v39 = vpop.permute.xlu0 %948  ;;  %v964_v47 = vadd.f32 %v956_v35, %v907_v45 }
 0x133   : > { %v961_v51 = vmul.f32 %v953_v36, %v3988_v61  ;;  %v962_v53 = vmul.f32 %v953_v36, %v3993_v0  ;;  %v959_v58 = vmul.f32 %v949_v39, %v3951_v34  ;;  %v960_v62 = vmul.f32 %v949_v39, %v3958_v38 }
 0x135   : > { %v967_v28 = vadd.f32 %v959_v58, %v910_v13  ;;  %v968_v29 = vadd.f32 %v960_v62, %v911_v15  ;;  %v969_v31 = vadd.f32 %v961_v51, %v912_v9  ;;  %v970_v30 = vadd.f32 %v962_v53, %v913_v10 }
 0x136   : > { %v1002_v4 = vpop.permute.xlu1 %1001  ;;  %v998_v5 = vpop.permute.xlu0 %997 }
 0x137   : > { %v1014_v57 = vmul.f32 %v1002_v4, %v4013_v11  ;;  %v1015_v18 = vmul.f32 %v1002_v4, %v4016_v12  ;;  %v1012_v59 = vmul.f32 %v998_v5, %v3999_v2  ;;  %v1013_v7 = vmul.f32 %v998_v5, %v4002_v3 }
 0x139   : > { %v4096_v16 = vadd.f32 %v1012_v59, %v963_v33  ;;  %v4098_v22 = vadd.f32 %v1013_v7, %v964_v47  ;;  %v4100_v23 = vadd.f32 %v1014_v57, %v965_v48  ;;  %v4102_v56 = vadd.f32 %v1015_v18, %v966_v50 }
 0x13a   : > { %v1010_v24 = vpop.permute.xlu1 %1009  ;;  %v1006_v25 = vpop.permute.xlu0 %1005 }
 0x13b   : > { %v1018_v19 = vmul.f32 %v1010_v24, %v4051_v55  ;;  %v1019_v32 = vmul.f32 %v1010_v24, %v4060_v6  ;;  %v1016_v20 = vmul.f32 %v1006_v25, %v4032_v41  ;;  %v1017_v35 = vmul.f32 %v1006_v25, %v4037_v46 }
 0x13d   : > { %v4108_v36 = vadd.f32 %v1016_v20, %v967_v28  ;;  %v4110_v39 = vadd.f32 %v1017_v35, %v968_v29  ;;  %v4112_v40 = vadd.f32 %v1018_v19, %v969_v31  ;;  %v4114_v42 = vadd.f32 %v1019_v32, %v970_v30 }
 0x13e   : > { %v1067_v44 = vpop.permute.xlu1 %1066  ;;  %v1063_v45 = vpop.permute.xlu0 %1062 }
 0x13f   : > { %v1077_v4 = vmul.f32 %v1063_v45, %v3977_v54  ;;  %v1078_v5 = vmul.f32 %v1063_v45, %v3973_v52  ;;  %v1080_v52 = vmul.f32 %v1067_v44, %v4009_v8 }
 0x142   : > { %v1075_v33 = vpop.permute.xlu1 %1074  ;;  %v1071_v47 = vpop.permute.xlu0 %1070 }
 0x143   : > { %v1082_v8 = vmul.f32 %v1071_v47, %v4021_v21  ;;  %v1084_v21 = vmul.f32 %v1075_v33, %v4055_v63  ;;  %v2891_v63 = vld [vmem:[%s4807_s3 + $0x2] ss:$0 sm:$0xff] }
 0x146   : > { %v1116_v48 = vpop.permute.xlu1 %1115  ;;  %v1112_v50 = vpop.permute.xlu0 %1111 }
 0x147   : > { %v1126_v58 = vmul.f32 %v1112_v50, %v3939_v26  ;;  %v1127_v62 = vmul.f32 %v1112_v50, %v3942_v27  ;;  %v1128_v57 = vmul.f32 %v1116_v48, %v3955_v37  ;;  %v1129_v15 = vmul.f32 %v1116_v48, %v3964_v43  ;;  %v2895_v48 = vld [vmem:[%s4865_s7 + $0x2] ss:$0 sm:$0xff]  ;;  %v2896_v50 = vld [vmem:[%s4865_s7 + $0x3] ss:$0 sm:$0xff] }
 0x148   : > { %v1079_v26 = vmul.f32 %v1067_v44, %v3996_v1  ;;  %v1081_v1 = vmul.f32 %v1071_v47, %v3985_v60  ;;  %v1083_v60 = vmul.f32 %v1075_v33, %v4045_v49  ;;  %v2889_v49 = vld [vmem:[%s4807_s3] ss:$0 sm:$0xff]  ;;  %v2894_v47 = vld [vmem:[%s4865_s7 + $0x1] ss:$0 sm:$0xff] }
 0x149   : > { %v1134_v7 = vadd.f32 %v1126_v58, %v1077_v4  ;;  %v1135_v9 = vadd.f32 %v1127_v62, %v1078_v5  ;;  %v2893_v33 = vld [vmem:[%s4865_s7] ss:$0 sm:$0xff]  ;;  %v2903_v58 = vld [vmem:[%s4865_s7 + $0x6] ss:$0 sm:$0xff]  ;;  %v2904_v4 = vld [vmem:[%s4865_s7 + $0x7] ss:$0 sm:$0xff] }
 0x14a   : > { %v1124_v51 = vpop.permute.xlu1 %1123  ;;  %v1120_v53 = vpop.permute.xlu0 %1119  ;;  %v1136_v28 = vadd.f32 %v1128_v57, %v1079_v26  ;;  %v2909_v57 = vld [vmem:[%s4865_s7 + $0x8] ss:$0 sm:$0xff]  ;;  %v2918_v26 = vld [vmem:[%s4865_s7 + $0xd] ss:$0 sm:$0xff] }
 0x14b   : > { %v1130_v29 = vmul.f32 %v1120_v53, %v3951_v34  ;;  %v1131_v43 = vmul.f32 %v1120_v53, %v3958_v38  ;;  %v1132_v34 = vmul.f32 %v1124_v51, %v3988_v61  ;;  %v1133_v38 = vmul.f32 %v1124_v51, %v3993_v0  ;;  %v2901_v51 = vld [vmem:[%s4865_s7 + $0x4] ss:$0 sm:$0xff]  ;;  %v2902_v53 = vld [vmem:[%s4865_s7 + $0x5] ss:$0 sm:$0xff] }
 0x14d   : > { %v1138_v19 = vadd.f32 %v1130_v29, %v1081_v1  ;;  %v1139_v32 = vadd.f32 %v1131_v43, %v1082_v8  ;;  %v1140_v44 = vadd.f32 %v1132_v34, %v1083_v60  ;;  %v1141_v61 = vadd.f32 %v1133_v38, %v1084_v21  ;;  %v2923_v29 = vld [vmem:[%s4866_s6 + $0x2] ss:$0 sm:$0xff]  ;;  %v2924_v43 = vld [vmem:[%s4866_s6 + $0x3] ss:$0 sm:$0xff]  ;;  %v2937_v34 = vld [vmem:[%s4866_s6 + $0x18] ss:$0 sm:$0xff] }
 0x14e   : > { %v1173_v18 = vpop.permute.xlu1 %1172  ;;  %v1169_v59 = vpop.permute.xlu0 %1168  ;;  %v2938_v38 = vld [vmem:[%s4866_s6 + $0x19] ss:$0 sm:$0xff]  ;;  %v2939_v60 = vld [vmem:[%s4866_s6 + $0x1a] ss:$0 sm:$0xff] }
 0x14f   : > { %v1183_v10 = vmul.f32 %v1169_v59, %v3999_v2  ;;  %v1184_v13 = vmul.f32 %v1169_v59, %v4002_v3  ;;  %v1185_v27 = vmul.f32 %v1173_v18, %v4013_v11  ;;  %v1186_v37 = vmul.f32 %v1173_v18, %v4016_v12  ;;  %v2910_v18 = vld [vmem:[%s4865_s7 + $0x9] ss:$0 sm:$0xff] }
 0x150   : > { %v1137_v2 = vadd.f32 %v1129_v15, %v1080_v52 }
 0x151   : > { %v1191_v24 = vadd.f32 %v1183_v10, %v1134_v7  ;;  %v1192_v54 = vadd.f32 %v1184_v13, %v1135_v9  ;;  %v1193_v11 = vadd.f32 %v1185_v27, %v1136_v28  ;;  %v2911_v9 = vld [vmem:[%s4865_s7 + $0xa] ss:$0 sm:$0xff]  ;;  %v2912_v10 = vld [vmem:[%s4865_s7 + $0xb] ss:$0 sm:$0xff]  ;;  %v2917_v13 = vld [vmem:[%s4865_s7 + $0xc] ss:$0 sm:$0xff] }
 0x152   : > { %v1177_v25 = vpop.permute.xlu0 %1176  ;;  %v1181_v12 = vpop.permute.xlu1 %1180  ;;  %v1194_v30 = vadd.f32 %v1186_v37, %v1137_v2  ;;  %v2922_v28 = vld [vmem:[%s4866_s6 + $0x1] ss:$0 sm:$0xff] }
 0x153   : > { %1207 = vrot.lane.b32.xlu0 %v1191_v24, %s3425_s19  ;;  %1209 = vrot.lane.b32.xlu1 %v1192_v54, %s3425_s19  ;;  %v1187_v3 = vmul.f32 %v1177_v25, %v4032_v41  ;;  %v1188_v31 = vmul.f32 %v1177_v25, %v4037_v46  ;;  %v1189_v41 = vmul.f32 %v1181_v12, %v4051_v55  ;;  %v2890_v55 = vld [vmem:[%s4807_s3 + $0x1] ss:$0 sm:$0xff]  ;;  %v2919_v24 = vld [vmem:[%s4865_s7 + $0xe] ss:$0 sm:$0xff] }
 0x154   : > { %v1190_v46 = vmul.f32 %v1181_v12, %v4060_v6  ;;  %v2892_v6 = vld [vmem:[%s4807_s3 + $0x3] ss:$0 sm:$0xff]  ;;  %v2920_v54 = vld [vmem:[%s4865_s7 + $0xf] ss:$0 sm:$0xff]  ;;  %v2921_v25 = vld [vmem:[%s4866_s6] ss:$0 sm:$0xff] }
 0x155   : > { %v1195_v20 = vadd.f32 %v1187_v3, %v1138_v19  ;;  %v1196_v35 = vadd.f32 %v1188_v31, %v1139_v32  ;;  %v1197_v0 = vadd.f32 %v1189_v41, %v1140_v44  ;;  %v2929_v3 = vld [vmem:[%s4866_s6 + $0xc] ss:$0 sm:$0xff]  ;;  %v2931_v31 = vld [vmem:[%s4866_s6 + $0xe] ss:$0 sm:$0xff]  ;;  %v2940_v41 = vld [vmem:[%s4866_s6 + $0x1b] ss:$0 sm:$0xff] }
 0x156   : > { %v1198_v45 = vadd.f32 %v1190_v46, %v1141_v61  ;;  %v4181_v62 = vpop.permute.xlu0 %1273  ;;  %v4186_v5 = vpop.permute.xlu1 %1277  ;;  %v2969_v46 = vld [vmem:[%s4866_s6 + $0x8] ss:$0 sm:$0xff]  ;;  %v2971_v44 = vld [vmem:[%s4866_s6 + $0xa] ss:$0 sm:$0xff] }
 0x157   : > { %1211 = vrot.lane.b32.xlu0 %v1193_v11, %s3425_s19  ;;  %1213 = vrot.lane.b32.xlu1 %v1194_v30, %s3425_s19  ;;  %v2930_v11 = vld [vmem:[%s4866_s6 + $0xd] ss:$0 sm:$0xff]  ;;  %v2932_v30 = vld [vmem:[%s4866_s6 + $0xf] ss:$0 sm:$0xff] }
 0x15a   : > { %v4194_v59 = vpop.permute.xlu0 %1281  ;;  %v4196_v7 = vpop.permute.xlu1 %1285 }
 0x15b   : > { %1215 = vrot.lane.b32.xlu0 %v1195_v20, %s3425_s19  ;;  %1217 = vrot.lane.b32.xlu1 %v1196_v35, %s3425_s19  ;;  %v2970_v35 = vld [vmem:[%s4866_s6 + $0x9] ss:$0 sm:$0xff] }
 0x15e   : > { %v4207_v15 = vpop.permute.xlu0 %1325  ;;  %v4212_v27 = vpop.permute.xlu1 %1329 }
 0x15f   : > { %1219 = vrot.lane.b32.xlu0 %v1197_v0, %s3425_s19  ;;  %1221 = vrot.lane.b32.xlu1 %v1198_v45, %s3425_s19  ;;  %v2972_v0 = vld [vmem:[%s4866_s6 + $0xb] ss:$0 sm:$0xff] }
 0x162   : > { %v4220_v52 = vpop.permute.xlu0 %1333  ;;  %v4222_v37 = vpop.permute.xlu1 %1337 }
 0x163   : > { %1540 = vperm.xlu0 %3139, %v2889_v49   ;;  %1544 = vperm.xlu1 %3140, %v2890_v55   ;;  %v2977_v49 = vld [vmem:[%s4866_s6 + $0x14] ss:$0 sm:$0xff]  ;;  %v2978_v55 = vld [vmem:[%s4866_s6 + $0x15] ss:$0 sm:$0xff] }
 0x166   : > { %v4233_v2 = vpop.permute.xlu0 %1374  ;;  %v4238_v1 = vpop.permute.xlu1 %1378 }
 0x167   : > { %1548 = vperm.xlu0 %3139, %v2891_v63   ;;  %1552 = vperm.xlu1 %3140, %v2892_v6  }
 0x16a   : > { %v4246_v8 = vpop.permute.xlu0 %1382  ;;  %v4248_v12 = vpop.permute.xlu1 %1386 }
 0x16b   : > { %1668 = vperm.xlu0 %3139, %v2893_v33   ;;  %1672 = vperm.xlu1 %3140, %v2894_v47   ;;  %v2979_v33 = vld [vmem:[%s4866_s6 + $0x16] ss:$0 sm:$0xff]  ;;  %v2980_v47 = vld [vmem:[%s4866_s6 + $0x17] ss:$0 sm:$0xff] }
 0x16e   : > { %v4259_v19 = vpop.permute.xlu0 %1431  ;;  %v4264_v32 = vpop.permute.xlu1 %1435 }
 0x16f   : > { %1676 = vperm.xlu0 %3139, %v2895_v48   ;;  %1680 = vperm.xlu1 %3140, %v2896_v50  }
 0x172   : > { %v4272_v20 = vpop.permute.xlu0 %1439  ;;  %v4274_v21 = vpop.permute.xlu1 %1443 }
 0x173   : > { %1717 = vperm.xlu0 %3139, %v2901_v51   ;;  %1721 = vperm.xlu1 %3140, %v2902_v53   ;;  %v2985_v51 = vld [vmem:[%s4866_s6 + $0x20] ss:$0 sm:$0xff]  ;;  %v2986_v53 = vld [vmem:[%s4866_s6 + $0x21] ss:$0 sm:$0xff] }
 0x176   : > { %v4285_v61 = vpop.permute.xlu0 %1488  ;;  %v4290_v45 = vpop.permute.xlu1 %1492 }
 0x177   : > { %1725 = vperm.xlu0 %3139, %v2903_v58   ;;  %1729 = vperm.xlu1 %3140, %v2904_v4   ;;  %v2987_v58 = vld [vmem:[%s4866_s6 + $0x22] ss:$0 sm:$0xff] }
 0x17a   : > { %v4298_v63 = vpop.permute.xlu0 %1496  ;;  %v4300_v6 = vpop.permute.xlu1 %1500 }
 0x17b   : > { %1774 = vperm.xlu0 %3139, %v2909_v57   ;;  %1778 = vperm.xlu1 %3140, %v2910_v18   ;;  %v2988_v57 = vld [vmem:[%s4866_s6 + $0x23] ss:$0 sm:$0xff] }
 0x17f   : > { %1782 = vperm.xlu0 %3139, %v2911_v9   ;;  %1786 = vperm.xlu1 %3140, %v2912_v10   ;;  %v2945_v9 = vld [vmem:[%s4866_s6 + $0x4] ss:$0 sm:$0xff]  ;;  %v2946_v10 = vld [vmem:[%s4866_s6 + $0x5] ss:$0 sm:$0xff] }
 0x183   : > { %1831 = vperm.xlu0 %3139, %v2917_v13   ;;  %1835 = vperm.xlu1 %3140, %v2918_v26  }
 0x187   : > { %1839 = vperm.xlu0 %3139, %v2919_v24   ;;  %1843 = vperm.xlu1 %3140, %v2920_v54   ;;  %v2947_v24 = vld [vmem:[%s4866_s6 + $0x6] ss:$0 sm:$0xff]  ;;  %v2948_v54 = vld [vmem:[%s4866_s6 + $0x7] ss:$0 sm:$0xff] }
 0x18b   : > { %1951 = vperm.xlu0 %3139, %v2921_v25   ;;  %1955 = vperm.xlu1 %3140, %v2922_v28   ;;  %v2953_v25 = vld [vmem:[%s4866_s6 + $0x10] ss:$0 sm:$0xff] }
 0x18f   : > { %1959 = vperm.xlu0 %3139, %v2923_v29   ;;  %1963 = vperm.xlu1 %3140, %v2924_v43   ;;  %v2954_v29 = vld [vmem:[%s4866_s6 + $0x11] ss:$0 sm:$0xff] }
 0x193   : > { %2000 = vperm.xlu0 %3139, %v2929_v3   ;;  %2004 = vperm.xlu1 %3140, %v2930_v11  }
 0x195   : > { %v833_v48 = vpop.permute.xlu0 %832  ;;  %v835_v50 = vpop.permute.xlu1 %834 }
 0x196   : > { %v857_v43 = vsel %vm856_vm10, 0.0, %v833_v48  ;;  %v858_v11 = vsel %vm856_vm10, 0.0, %v835_v50 }
 0x197   : > { %2008 = vperm.xlu0 %3139, %v2931_v31   ;;  %2012 = vperm.xlu1 %3140, %v2932_v30   ;;  %v2955_v31 = vld [vmem:[%s4866_s6 + $0x12] ss:$0 sm:$0xff]  ;;  %v1028_v30 = vadd.f32 %v4096_v16, %v857_v43 }
 0x199   : > { %v837_v4 = vpop.permute.xlu0 %836  ;;  %v839_v18 = vpop.permute.xlu1 %838 }
 0x19b   : > { %2057 = vperm.xlu0 %3139, %v2937_v34   ;;  %2061 = vperm.xlu1 %3140, %v2938_v38   ;;  %v2956_v38 = vld [vmem:[%s4866_s6 + $0x13] ss:$0 sm:$0xff] }
 0x19d   : > { %v841_v13 = vpop.permute.xlu0 %840  ;;  %v843_v26 = vpop.permute.xlu1 %842 }
 0x19e   : > { %v861_v16 = vsel %vm856_vm10, 0.0, %v841_v13 }
 0x19f   : > { %2065 = vperm.xlu0 %3139, %v2939_v60   ;;  %2069 = vperm.xlu1 %3140, %v2940_v41   ;;  %v1029_v60 = vadd.f32 %v4098_v22, %v858_v11  ;;  %v862_v22 = vsel %vm856_vm10, 0.0, %v843_v26 }
 0x1a0   : > { %v1033_v13 = vadd.f32 %v4110_v39, %v862_v22  ;;  %v2964_v39 = vld [vmem:[%s4866_s6 + $0x1f] ss:$0 sm:$0xff] }
 0x1a1   : > { %v845_v28 = vpop.permute.xlu0 %844  ;;  %v847_v3 = vpop.permute.xlu1 %846 }
 0x1a2   : > { %v864_v48 = vsel %vm856_vm10, 0.0, %v847_v3 }
 0x1a3   : > { %2325 = vperm.xlu0 %3139, %v2969_v46   ;;  %2329 = vperm.xlu1 %3140, %v2970_v35  }
 0x1a7   : > { %2333 = vperm.xlu0 %3139, %v2971_v44   ;;  %2337 = vperm.xlu1 %3140, %v2972_v0   ;;  %v859_v0 = vsel %vm856_vm10, 0.0, %v837_v4 }
 0x1ab   : > { %2374 = vperm.xlu0 %3139, %v2977_v49   ;;  %2378 = vperm.xlu1 %3140, %v2978_v55   ;;  %v860_v49 = vsel %vm856_vm10, 0.0, %v839_v18  ;;  %v1030_v18 = vadd.f32 %v4100_v23, %v859_v0 }
 0x1af   : > { %2382 = vperm.xlu0 %3139, %v2979_v33   ;;  %2386 = vperm.xlu1 %3140, %v2980_v47   ;;  %v2961_v33 = vld [vmem:[%s4866_s6 + $0x1c] ss:$0 sm:$0xff]  ;;  %v863_v47 = vsel %vm856_vm10, 0.0, %v845_v28 }
 0x1b0   : > { %v1034_v26 = vadd.f32 %v4112_v40, %v863_v47 }
 0x1b3   : > { %2431 = vperm.xlu0 %3139, %v2985_v51   ;;  %2435 = vperm.xlu1 %3140, %v2986_v53   ;;  %v2962_v53 = vld [vmem:[%s4866_s6 + $0x1d] ss:$0 sm:$0xff] }
 0x1b7   : > { %2439 = vperm.xlu0 %3139, %v2987_v58   ;;  %2443 = vperm.xlu1 %3140, %v2988_v57  }
 0x1bb   : > { %2154 = vperm.xlu0 %3139, %v2945_v9   ;;  %2158 = vperm.xlu1 %3140, %v2946_v10   ;;  %v1031_v9 = vadd.f32 %v4102_v56, %v860_v49  ;;  %v1032_v10 = vadd.f32 %v4108_v36, %v861_v16 }
 0x1bf   : > { %2162 = vperm.xlu0 %3139, %v2947_v24   ;;  %2166 = vperm.xlu1 %3140, %v2948_v54   ;;  %v1035_v24 = vadd.f32 %v4114_v42, %v864_v48 }
 0x1c3   : > { %2203 = vperm.xlu0 %3139, %v2953_v25   ;;  %2207 = vperm.xlu1 %3140, %v2954_v29  }
 0x1c5   : > { %v1208_v34 = vpop.permute.xlu0 %1207  ;;  %v1210_v46 = vpop.permute.xlu1 %1209 }
 0x1c6   : > { %v1232_v41 = vsel %vm1231_vm11, %v1208_v34, 0.0  ;;  %v1233_v44 = vsel %vm1231_vm11, %v1210_v46, 0.0 }
 0x1c7   : > { %v1240_v35 = vadd.f32 %v1232_v41, %v1028_v30  ;;  %2211 = vperm.xlu0 %3139, %v2955_v31   ;;  %v1241_v55 = vadd.f32 %v1233_v44, %v1029_v60  ;;  %2215 = vperm.xlu1 %3140, %v2956_v38  }
 0x1c9   : > { %v1288_v50 = vadd.f32 %v4181_v62, %v1240_v35  ;;  %v1212_v51 = vpop.permute.xlu0 %1211  ;;  %v1289_v58 = vadd.f32 %v4181_v62, %v1241_v55  ;;  %v1214_v57 = vpop.permute.xlu1 %1213  ;;  %v2963_v62 = vld [vmem:[%s4866_s6 + $0x1e] ss:$0 sm:$0xff] }
 0x1ca   : > { %v1234_v4 = vsel %vm1231_vm11, %v1212_v51, 0.0  ;;  %v1235_v36 = vsel %vm1231_vm11, %v1214_v57, 0.0 }
 0x1cb   : > { %2260 = vperm.xlu0 %3139, %v2961_v33   ;;  %v1340_v54 = vmul.f32 %v4207_v15, %v1288_v50  ;;  %2264 = vperm.xlu1 %3140, %v2962_v53   ;;  %v1342_v23 = vmul.f32 %v4212_v27, %v1288_v50  ;;  %v1344_v56 = vmul.f32 %v4220_v52, %v1288_v50 }
 0x1cc   : > { %v1242_v25 = vadd.f32 %v1234_v4, %v1030_v18  ;;  %v1346_v40 = vmul.f32 %v4222_v37, %v1288_v50  ;;  %v1341_v42 = vmul.f32 %v4207_v15, %v1289_v58  ;;  %v1243_v29 = vadd.f32 %v1235_v36, %v1031_v9  ;;  %v2989_v15 = vld [vmem:[%s4867_s12] ss:$0 sm:$0xff]  ;;  %v2992_v18 = vld [vmem:[%s4867_s12 + $0x3] ss:$0 sm:$0xff] }
 0x1cd   : > { %v1216_v28 = vpop.permute.xlu0 %1215  ;;  %v1218_v3 = vpop.permute.xlu1 %1217  ;;  %v1343_v11 = vmul.f32 %v4212_v27, %v1289_v58  ;;  %v1345_v31 = vmul.f32 %v4220_v52, %v1289_v58  ;;  %v1347_v38 = vmul.f32 %v4222_v37, %v1289_v58  ;;  %v2990_v37 = vld [vmem:[%s4867_s12 + $0x1] ss:$0 sm:$0xff] }
 0x1ce   : > { %v1236_v43 = vsel %vm1231_vm11, %v1216_v28, 0.0  ;;  %v1290_v30 = vadd.f32 %v4186_v5, %v1242_v25  ;;  %v1237_v34 = vsel %vm1231_vm11, %v1218_v3, 0.0  ;;  %v1291_v60 = vadd.f32 %v4186_v5, %v1243_v29 }
 0x1cf   : > { %2268 = vperm.xlu0 %3139, %v2963_v62   ;;  %v1244_v41 = vadd.f32 %v1236_v43, %v1032_v10  ;;  %v1245_v46 = vadd.f32 %v1237_v34, %v1033_v13  ;;  %2272 = vperm.xlu1 %3140, %v2964_v39  }
 0x1d0   : > { %v1389_v27 = vmul.f32 %v4233_v2, %v1290_v30  ;;  %v1391_v52 = vmul.f32 %v4238_v1, %v1290_v30  ;;  %v1393_v35 = vmul.f32 %v4246_v8, %v1290_v30  ;;  %v1395_v44 = vmul.f32 %v4248_v12, %v1290_v30 }
 0x1d1   : > { %v1390_v5 = vmul.f32 %v4233_v2, %v1291_v60  ;;  %v1392_v0 = vmul.f32 %v4238_v1, %v1291_v60  ;;  %v1394_v49 = vmul.f32 %v4246_v8, %v1291_v60  ;;  %v1396_v16 = vmul.f32 %v4248_v12, %v1291_v60  ;;  %v1220_v55 = vpop.permute.xlu0 %1219  ;;  %v1222_v33 = vpop.permute.xlu1 %1221  ;;  %v2991_v2 = vld [vmem:[%s4867_s12 + $0x2] ss:$0 sm:$0xff] }
 0x1d2   : > { %v1397_v22 = vadd.f32 %v1389_v27, %v1340_v54  ;;  %v1399_v47 = vadd.f32 %v1391_v52, %v1342_v23  ;;  %v1401_v48 = vadd.f32 %v1393_v35, %v1344_v56  ;;  %v1403_v50 = vadd.f32 %v1395_v44, %v1346_v40 }
 0x1d3   : > { %2535 = vperm.xlu0 %3139, %v2989_v15   ;;  %v1398_v51 = vadd.f32 %v1390_v5, %v1341_v42  ;;  %v1400_v53 = vadd.f32 %v1392_v0, %v1343_v11  ;;  %v1402_v58 = vadd.f32 %v1394_v49, %v1345_v31  ;;  %v1404_v4 = vadd.f32 %v1396_v16, %v1347_v38 }
 0x1d4   : > { %2539 = vperm.xlu1 %3140, %v2990_v37   ;;  %v1292_v1 = vadd.f32 %v4194_v59, %v1244_v41  ;;  %v1293_v8 = vadd.f32 %v4194_v59, %v1245_v46  ;;  %v1238_v12 = vsel %vm1231_vm11, %v1220_v55, 0.0  ;;  %v1239_v57 = vsel %vm1231_vm11, %v1222_v33, 0.0 }
 0x1d5   : > { %v1246_v9 = vadd.f32 %v1238_v12, %v1034_v26  ;;  %v1247_v10 = vadd.f32 %v1239_v57, %v1035_v24 }
 0x1d6   : > { %v1446_v13 = vmul.f32 %v4259_v19, %v1292_v1  ;;  %v1448_v54 = vmul.f32 %v4264_v32, %v1292_v1  ;;  %v1450_v62 = vmul.f32 %v4272_v20, %v1292_v1  ;;  %v1452_v23 = vmul.f32 %v4274_v21, %v1292_v1 }
 0x1d7   : > { %2543 = vperm.xlu0 %3139, %v2991_v2   ;;  %v1447_v59 = vmul.f32 %v4259_v19, %v1293_v8  ;;  %v1449_v56 = vmul.f32 %v4264_v32, %v1293_v8  ;;  %v1451_v25 = vmul.f32 %v4272_v20, %v1293_v8  ;;  %v1453_v36 = vmul.f32 %v4274_v21, %v1293_v8 }
 0x1d8   : > { %2547 = vperm.xlu1 %3140, %v2992_v18   ;;  %v1454_v26 = vadd.f32 %v1446_v13, %v1397_v22  ;;  %v1456_v24 = vadd.f32 %v1448_v54, %v1399_v47  ;;  %v1458_v28 = vadd.f32 %v1450_v62, %v1401_v48  ;;  %v1460_v39 = vadd.f32 %v1452_v23, %v1403_v50 }
 0x1d9   : > { %v1455_v40 = vadd.f32 %v1447_v59, %v1398_v51  ;;  %v1457_v42 = vadd.f32 %v1449_v56, %v1400_v53  ;;  %v1459_v29 = vadd.f32 %v1451_v25, %v1402_v58  ;;  %v1461_v43 = vadd.f32 %v1453_v36, %v1404_v4 }
 0x1da   : > { %v1294_v3 = vadd.f32 %v4196_v7, %v1246_v9  ;;  %v1295_v11 = vadd.f32 %v4196_v7, %v1247_v10 }
 0x1dc   : > { %v1503_v19 = vmul.f32 %v4285_v61, %v1294_v3  ;;  %v1505_v32 = vmul.f32 %v4290_v45, %v1294_v3  ;;  %v1507_v20 = vmul.f32 %v4298_v63, %v1294_v3  ;;  %v1509_v21 = vmul.f32 %v4300_v6, %v1294_v3 }
 0x1dd   : > { %v1504_v31 = vmul.f32 %v4285_v61, %v1295_v11  ;;  %v1506_v30 = vmul.f32 %v4290_v45, %v1295_v11  ;;  %v1508_v34 = vmul.f32 %v4298_v63, %v1295_v11  ;;  %v1510_v38 = vmul.f32 %v4300_v6, %v1295_v11 }
 0x1de   : > { %v1511_v60 = vadd.f32 %v1503_v19, %v1454_v26  ;;  %v1513_v41 = vadd.f32 %v1505_v32, %v1456_v24  ;;  %v1515_v46 = vadd.f32 %v1507_v20, %v1458_v28  ;;  %v1517_v7 = vadd.f32 %v1509_v21, %v1460_v39 }
 0x1df   : > { %v1512_v15 = vadd.f32 %v1504_v31, %v1455_v40  ;;  %v1514_v27 = vadd.f32 %v1506_v30, %v1457_v42  ;;  %v1516_v52 = vadd.f32 %v1508_v34, %v1459_v29  ;;  %v1518_v35 = vadd.f32 %v1510_v38, %v1461_v43 }
 0x1e2   : > { %v1541_v44 = vpop.permute.xlu0 %1540  ;;  %v1545_v0 = vpop.permute.xlu1 %1544 }
 0x1e3   : > { %v1555_v37 = vadd.f32 %v1541_v44, %v1511_v60  ;;  %v1556_v5 = vadd.f32 %v1541_v44, %v1512_v15  ;;  %v1557_v49 = vadd.f32 %v1545_v0, %v1513_v41  ;;  %v1558_v61 = vadd.f32 %v1545_v0, %v1514_v27 }
 0x1e5   : > { %v1571_v16 = vmul.f32 0.70710677, %v1555_v37  ;;  %v1572_v45 = vmul.f32 0.70710677, %v1556_v5  ;;  %v1573_v55 = vmul.f32 0.70710677, %v1557_v49 }
 0x1e6   : > { %v1574_v63 = vmul.f32 0.70710677, %v1558_v61  ;;  %v1549_v33 = vpop.permute.xlu0 %1548  ;;  %v1553_v47 = vpop.permute.xlu1 %1552  ;;  %v1563_v9 = vmul.f32 0.5, %v1555_v37  ;;  %v1564_v62 = vmul.f32 0.5, %v1556_v5  ;;  %v1565_v36 = vmul.f32 0.5, %v1557_v49 }
 0x1e7   : > { %3141 = verf.f32 %v1571_v16  ;;  %v1559_v6 = vadd.f32 %v1549_v33, %v1515_v46  ;;  %v1560_v22 = vadd.f32 %v1549_v33, %v1516_v52  ;;  %v1561_v48 = vadd.f32 %v1553_v47, %v1517_v7 }
 0x1e8   : > { %3143 = verf.f32 %v1572_v45  ;;  %v1562_v50 = vadd.f32 %v1553_v47, %v1518_v35  ;;  %v1566_v39 = vmul.f32 0.5, %v1558_v61 }
 0x1e9   : > { %3145 = verf.f32 %v1573_v55  ;;  %v1575_v51 = vmul.f32 0.70710677, %v1559_v6  ;;  %v1576_v53 = vmul.f32 0.70710677, %v1560_v22  ;;  %v1577_v4 = vmul.f32 0.70710677, %v1561_v48 }
 0x1ea   : > { %3147 = verf.f32 %v1574_v63  ;;  %v4432_v58 = vpop.permute.xlu0 %1668  ;;  %v1578_v2 = vmul.f32 0.70710677, %v1562_v50  ;;  %v4434_v1 = vpop.permute.xlu1 %1672  ;;  %v1567_v3 = vmul.f32 0.5, %v1559_v6  ;;  %v1568_v31 = vmul.f32 0.5, %v1560_v22 }
 0x1eb   : > { %3149 = verf.f32 %v1575_v51  ;;  %v1569_v27 = vmul.f32 0.5, %v1561_v48  ;;  %v1570_v37 = vmul.f32 0.5, %v1562_v50 }
 0x1ec   : > { %3151 = verf.f32 %v1576_v53 }
 0x1ed   : > { %3153 = verf.f32 %v1577_v4 }
 0x1ee   : > { %3155 = verf.f32 %v1578_v2  ;;  %v4436_v8 = vpop.permute.xlu0 %1676  ;;  %v4438_v12 = vpop.permute.xlu1 %1680 }
 0x1f1   : > { %v3142_v57 = vpop.eup %3141 }
 0x1f2   : > { %v3144_v18 = vpop.eup %3143  ;;  %v1587_v10 = vadd.f32 1.0, %v3142_v57  ;;  %v4440_v13 = vpop.permute.xlu0 %1717 }
 0x1f3   : > { %v3146_v54 = vpop.eup %3145  ;;  %v1588_v23 = vadd.f32 1.0, %v3144_v18  ;;  %v4442_v59 = vpop.permute.xlu1 %1721 }
 0x1f4   : > { %v3148_v56 = vpop.eup %3147  ;;  %v1595_v25 = vmul.f32 %v1587_v10, %v1563_v9  ;;  %v1589_v26 = vadd.f32 1.0, %v3146_v54 }
 0x1f5   : > { %v3150_v24 = vpop.eup %3149  ;;  %v1596_v28 = vmul.f32 %v1588_v23, %v1564_v62  ;;  %v1590_v40 = vadd.f32 1.0, %v3148_v56 }
 0x1f6   : > { %v3152_v42 = vpop.eup %3151  ;;  %v1611_v29 = vmul.f32 0.70710677, %v1595_v25  ;;  %v1597_v43 = vmul.f32 %v1589_v26, %v1565_v36  ;;  %v1591_v11 = vadd.f32 1.0, %v3150_v24  ;;  %v4444_v19 = vpop.permute.xlu0 %1725  ;;  %v1603_v47 = vmul.f32 0.5, %v1595_v25 }
 0x1f7   : > { %v3154_v32 = vpop.eup %3153  ;;  %v1612_v20 = vmul.f32 0.70710677, %v1596_v28  ;;  %v1598_v21 = vmul.f32 %v1590_v40, %v1566_v39  ;;  %v1592_v30 = vadd.f32 1.0, %v3152_v42  ;;  %v4446_v34 = vpop.permute.xlu1 %1729  ;;  %v1604_v53 = vmul.f32 0.5, %v1596_v28 }
 0x1f8   : > { %v3156_v38 = vpop.eup %3155  ;;  %3157 = verf.f32 %v1611_v29  ;;  %v1613_v60 = vmul.f32 0.70710677, %v1597_v43  ;;  %v1599_v41 = vmul.f32 %v1591_v11, %v1567_v3  ;;  %v1593_v52 = vadd.f32 1.0, %v3154_v32 }
 0x1f9   : > { %3159 = verf.f32 %v1612_v20  ;;  %v1614_v46 = vmul.f32 0.70710677, %v1598_v21  ;;  %v1600_v7 = vmul.f32 %v1592_v30, %v1568_v31  ;;  %v1594_v5 = vadd.f32 1.0, %v3156_v38 }
 0x1fa   : > { %3161 = verf.f32 %v1613_v60  ;;  %v1615_v15 = vmul.f32 0.70710677, %v1599_v41  ;;  %v4448_v35 = vpop.permute.xlu0 %1774  ;;  %v1601_v49 = vmul.f32 %v1593_v52, %v1569_v27  ;;  %v1605_v57 = vmul.f32 0.5, %v1597_v43 }
 0x1fb   : > { %3163 = verf.f32 %v1614_v46  ;;  %v1616_v44 = vmul.f32 0.70710677, %v1600_v7  ;;  %v4450_v0 = vpop.permute.xlu1 %1778  ;;  %v1602_v61 = vmul.f32 %v1594_v5, %v1570_v37  ;;  %v1606_v18 = vmul.f32 0.5, %v1598_v21 }
 0x1fc   : > { %3165 = verf.f32 %v1615_v15  ;;  %v1617_v16 = vmul.f32 0.70710677, %v1601_v49  ;;  %v1607_v23 = vmul.f32 0.5, %v1599_v41  ;;  %v1608_v56 = vmul.f32 0.5, %v1600_v7 }
 0x1fd   : > { %3167 = verf.f32 %v1616_v44  ;;  %v1618_v55 = vmul.f32 0.70710677, %v1602_v61  ;;  %v1609_v39 = vmul.f32 0.5, %v1601_v49  ;;  %v1610_v40 = vmul.f32 0.5, %v1602_v61 }
 0x1fe   : > { %v4452_v45 = vpop.permute.xlu0 %1782  ;;  %3169 = verf.f32 %v1617_v16 }
 0x1ff   : > { %v4454_v63 = vpop.permute.xlu1 %1786  ;;  %3171 = verf.f32 %v1618_v55 }
 0x202   : > { %v3158_v33 = vpop.eup %3157  ;;  %v4456_v6 = vpop.permute.xlu0 %1831 }
 0x203   : > { %v3160_v22 = vpop.eup %3159  ;;  %v1627_v48 = vadd.f32 1.0, %v3158_v33  ;;  %v4458_v50 = vpop.permute.xlu1 %1835 }
 0x204   : > { %v3162_v51 = vpop.eup %3161  ;;  %v1628_v4 = vadd.f32 1.0, %v3160_v22 }
 0x205   : > { %v3164_v2 = vpop.eup %3163  ;;  %v1629_v9 = vadd.f32 1.0, %v3162_v51  ;;  %v1635_v10 = vmul.f32 %v1627_v48, %v1603_v47 }
 0x206   : > { %v3166_v54 = vpop.eup %3165  ;;  %v1630_v62 = vadd.f32 1.0, %v3164_v2  ;;  %v1636_v36 = vmul.f32 %v1628_v4, %v1604_v53  ;;  %v4460_v26 = vpop.permute.xlu0 %1839 }
 0x207   : > { %v3168_v24 = vpop.eup %3167  ;;  %v1631_v25 = vadd.f32 1.0, %v3166_v54  ;;  %v1683_v42 = vmul.f32 %v4432_v58, %v1635_v10  ;;  %v4463_v28 = vpop.permute.xlu1 %1843  ;;  %v1685_v3 = vmul.f32 %v4434_v1, %v1635_v10  ;;  %v1687_v11 = vmul.f32 %v4436_v8, %v1635_v10 }
 0x208   : > { %v1632_v29 = vadd.f32 1.0, %v3168_v24  ;;  %v1684_v43 = vmul.f32 %v4432_v58, %v1636_v36  ;;  %v1686_v32 = vmul.f32 %v4434_v1, %v1636_v36  ;;  %v1688_v20 = vmul.f32 %v4436_v8, %v1636_v36  ;;  %v3170_v30 = vpop.eup %3169 }
 0x209   : > { %v1637_v21 = vmul.f32 %v1629_v9, %v1605_v57  ;;  %v1638_v31 = vmul.f32 %v1630_v62, %v1606_v18  ;;  %v1689_v38 = vmul.f32 %v4438_v12, %v1635_v10  ;;  %v1690_v60 = vmul.f32 %v4438_v12, %v1636_v36  ;;  %v3172_v58 = vpop.eup %3171 }
 0x20a   : > { %v1639_v41 = vmul.f32 %v1631_v25, %v1607_v23  ;;  %v1640_v46 = vmul.f32 %v1632_v29, %v1608_v56  ;;  %v4472_v7 = vpop.permute.xlu0 %1951  ;;  %v1633_v15 = vadd.f32 1.0, %v3170_v30  ;;  %v1634_v44 = vadd.f32 1.0, %v3172_v58 }
 0x20b   : > { %v1732_v27 = vmul.f32 %v4440_v13, %v1637_v21  ;;  %v1733_v52 = vmul.f32 %v4440_v13, %v1638_v31  ;;  %v1734_v1 = vmul.f32 %v4442_v59, %v1637_v21  ;;  %v4477_v8 = vpop.permute.xlu1 %1955  ;;  %v1735_v37 = vmul.f32 %v4442_v59, %v1638_v31 }
 0x20c   : > { %v1736_v5 = vmul.f32 %v4444_v19, %v1637_v21  ;;  %v1737_v12 = vmul.f32 %v4444_v19, %v1638_v31  ;;  %v1738_v55 = vmul.f32 %v4446_v34, %v1637_v21  ;;  %v1739_v13 = vmul.f32 %v4446_v34, %v1638_v31 }
 0x20d   : > { %v1740_v49 = vadd.f32 %v1732_v27, %v1683_v42  ;;  %v1741_v61 = vadd.f32 %v1733_v52, %v1684_v43  ;;  %v1742_v16 = vadd.f32 %v1734_v1, %v1685_v3  ;;  %v1743_v33 = vadd.f32 %v1735_v37, %v1686_v32 }
 0x20e   : > { %v1744_v22 = vadd.f32 %v1736_v5, %v1687_v11  ;;  %v1745_v47 = vadd.f32 %v1737_v12, %v1688_v20  ;;  %v4484_v48 = vpop.permute.xlu0 %1959  ;;  %v1746_v51 = vadd.f32 %v1738_v55, %v1689_v38  ;;  %v1789_v53 = vmul.f32 %v4448_v35, %v1639_v41 }
 0x20f   : > { %v1790_v59 = vmul.f32 %v4448_v35, %v1640_v46  ;;  %v1791_v4 = vmul.f32 %v4450_v0, %v1639_v41  ;;  %v4489_v19 = vpop.permute.xlu1 %1963  ;;  %v1747_v2 = vadd.f32 %v1739_v13, %v1690_v60  ;;  %v1792_v57 = vmul.f32 %v4450_v0, %v1640_v46 }
 0x210   : > { %v1793_v18 = vmul.f32 %v4452_v45, %v1639_v41  ;;  %v1794_v9 = vmul.f32 %v4452_v45, %v1640_v46  ;;  %v1797_v10 = vadd.f32 %v1789_v53, %v1740_v49  ;;  %v1795_v62 = vmul.f32 %v4454_v63, %v1639_v41 }
 0x211   : > { %v1798_v34 = vadd.f32 %v1790_v59, %v1741_v61  ;;  %v1799_v54 = vadd.f32 %v1791_v4, %v1742_v16  ;;  %v1800_v23 = vadd.f32 %v1792_v57, %v1743_v33  ;;  %v1796_v35 = vmul.f32 %v4454_v63, %v1640_v46 }
 0x212   : > { %v1801_v56 = vadd.f32 %v1793_v18, %v1744_v22  ;;  %v1802_v36 = vadd.f32 %v1794_v9, %v1745_v47  ;;  %v2001_v24 = vpop.permute.xlu0 %2000  ;;  %v1803_v25 = vadd.f32 %v1795_v62, %v1746_v51  ;;  %v1641_v42 = vmul.f32 %v1633_v15, %v1609_v39 }
 0x213   : > { %v1642_v29 = vmul.f32 %v1634_v44, %v1610_v40  ;;  %v2005_v43 = vpop.permute.xlu1 %2004  ;;  %v1804_v0 = vadd.f32 %v1796_v35, %v1747_v2 }
 0x214   : > { %v1846_v3 = vmul.f32 %v4456_v6, %v1641_v42  ;;  %v1848_v11 = vmul.f32 %v4458_v50, %v1641_v42  ;;  %v1850_v20 = vmul.f32 %v4460_v26, %v1641_v42  ;;  %v1852_v63 = vmul.f32 %v4463_v28, %v1641_v42 }
 0x215   : > { %v1847_v45 = vmul.f32 %v4456_v6, %v1642_v29  ;;  %v1849_v32 = vmul.f32 %v4458_v50, %v1642_v29  ;;  %v1851_v21 = vmul.f32 %v4460_v26, %v1642_v29  ;;  %v1853_v31 = vmul.f32 %v4463_v28, %v1642_v29 }
 0x216   : > { %v2009_v39 = vpop.permute.xlu0 %2008  ;;  %v1854_v40 = vadd.f32 %v1846_v3, %v1797_v10  ;;  %v1856_v38 = vadd.f32 %v1848_v11, %v1799_v54  ;;  %v1858_v46 = vadd.f32 %v1850_v20, %v1801_v56  ;;  %v1860_v58 = vadd.f32 %v1852_v63, %v1803_v25 }
 0x217   : > { %v1855_v30 = vadd.f32 %v1847_v45, %v1798_v34  ;;  %v1857_v60 = vadd.f32 %v1849_v32, %v1800_v23  ;;  %v2013_v41 = vpop.permute.xlu1 %2012  ;;  %v1859_v6 = vadd.f32 %v1851_v21, %v1802_v36  ;;  %v1861_v15 = vadd.f32 %v1853_v31, %v1804_v0 }
 0x218   : > { %v4505_v50 = vmul.f32 %v3927_v14, %v1854_v40  ;;  %v4511_v26 = vmul.f32 %v3927_v14, %v1856_v38  ;;  %v4517_v52 = vmul.f32 %v3927_v14, %v1858_v46  ;;  %v4523_v44 = vmul.f32 %v3927_v14, %v1860_v58 }
 0x219   : > { %v4508_v27 = vmul.f32 %v3930_v17, %v1855_v30  ;;  %v4514_v28 = vmul.f32 %v3930_v17, %v1857_v60  ;;  %v4520_v1 = vmul.f32 %v3930_v17, %v1859_v6  ;;  %v4526_v37 = vmul.f32 %v3930_v17, %v1861_v15 }
 0x21a   : > { %v2058_v5 = vpop.permute.xlu0 %2057  ;;  %v1878_v12 = vrot.slane %v4505_v50, 7  ;;  %v1881_v61 = vrot.slane %v4511_v26, 7  ;;  %v1884_v33 = vrot.slane %v4517_v52, 7  ;;  %v1887_v14 = vrot.slane %v4523_v44, 7 }
 0x21b   : > { %v1879_v49 = vrot.slane %v4508_v27, 7  ;;  %v1882_v16 = vrot.slane %v4514_v28, 7  ;;  %v2062_v55 = vpop.permute.xlu1 %2061  ;;  %v1885_v22 = vrot.slane %v4520_v1, 7  ;;  %v1888_v47 = vrot.slane %v4526_v37, 7 }
 0x21c   : > { %v4540_v13 = vsel %vm611_vm7, 0.0, %v1878_v12  ;;  %v4546_v53 = vsel %vm611_vm7, 0.0, %v1881_v61  ;;  %v4560_v10 = vsel %vm611_vm7, 0.0, %v1884_v33  ;;  %v4566_v54 = vsel %vm611_vm7, 0.0, %v1887_v14 }
 0x21d   : > { %v4537_v17 = vsel %vm611_vm7, %v1878_v12, %v1879_v49  ;;  %v4543_v51 = vsel %vm611_vm7, %v1881_v61, %v1882_v16  ;;  %v1966_v59 = vmul.f32 %v4472_v7, %v4540_v13  ;;  %v1968_v2 = vmul.f32 %v4477_v8, %v4546_v53 }
 0x21e   : > { %v1967_v4 = vmul.f32 %v4472_v7, %v4537_v17  ;;  %v1969_v57 = vmul.f32 %v4477_v8, %v4543_v51  ;;  %v2066_v18 = vpop.permute.xlu0 %2065  ;;  %v4557_v9 = vsel %vm611_vm7, %v1884_v33, %v1885_v22  ;;  %v4563_v34 = vsel %vm611_vm7, %v1887_v14, %v1888_v47 }
 0x21f   : > { %v2070_v7 = vpop.permute.xlu1 %2069  ;;  %v1970_v62 = vmul.f32 %v4484_v48, %v4560_v10  ;;  %v1971_v8 = vmul.f32 %v4484_v48, %v4557_v9  ;;  %v1972_v23 = vmul.f32 %v4489_v19, %v4566_v54  ;;  %v1973_v56 = vmul.f32 %v4489_v19, %v4563_v34 }
 0x220   : > { %v2015_v36 = vmul.f32 %v2001_v24, %v4505_v50  ;;  %v2016_v35 = vmul.f32 %v2001_v24, %v4508_v27  ;;  %v2017_v25 = vmul.f32 %v2005_v43, %v4511_v26  ;;  %v2018_v42 = vmul.f32 %v2005_v43, %v4514_v28 }
 0x221   : > { %v2019_v29 = vmul.f32 %v2009_v39, %v4517_v52  ;;  %v2020_v0 = vmul.f32 %v2009_v39, %v4520_v1  ;;  %v2021_v48 = vmul.f32 %v2013_v41, %v4523_v44  ;;  %v2022_v3 = vmul.f32 %v2013_v41, %v4526_v37 }
 0x222   : > { %v2326_v45 = vpop.permute.xlu0 %2325  ;;  %v2023_v11 = vadd.f32 %v2015_v36, %v1966_v59  ;;  %v2024_v32 = vadd.f32 %v2016_v35, %v1967_v4  ;;  %v2025_v19 = vadd.f32 %v2017_v25, %v1968_v2  ;;  %v2026_v20 = vadd.f32 %v2018_v42, %v1969_v57 }
 0x223   : > { %v2330_v21 = vpop.permute.xlu1 %2329  ;;  %v2027_v63 = vadd.f32 %v2019_v29, %v1970_v62  ;;  %v2028_v24 = vadd.f32 %v2020_v0, %v1971_v8  ;;  %v2029_v31 = vadd.f32 %v2021_v48, %v1972_v23  ;;  %v2030_v40 = vadd.f32 %v2022_v3, %v1973_v56 }
 0x224   : > { %v1902_v43 = vrot.slane %v4505_v50, 1  ;;  %v1903_v30 = vrot.slane %v4508_v27, 1  ;;  %v1905_v39 = vrot.slane %v4511_v26, 1  ;;  %v1906_v38 = vrot.slane %v4514_v28, 1 }
 0x225   : > { %v1908_v60 = vrot.slane %v4517_v52, 1  ;;  %v1909_v41 = vrot.slane %v4520_v1, 1  ;;  %v1911_v46 = vrot.slane %v4523_v44, 1  ;;  %v1912_v6 = vrot.slane %v4526_v37, 1 }
 0x226   : > { %v2334_v58 = vpop.permute.xlu0 %2333  ;;  %v4593_v15 = vsel %vm636_vm8, %v1902_v43, %v1903_v30  ;;  %v4596_v12 = vsel %vm657_vm9, %v1903_v30, 0.0  ;;  %v4599_v49 = vsel %vm636_vm8, %v1905_v39, %v1906_v38  ;;  %v4602_v61 = vsel %vm657_vm9, %v1906_v38, 0.0 }
 0x227   : > { %v2338_v16 = vpop.permute.xlu1 %2337  ;;  %v2072_v33 = vmul.f32 %v2058_v5, %v4593_v15  ;;  %v2073_v22 = vmul.f32 %v2058_v5, %v4596_v12  ;;  %v2074_v14 = vmul.f32 %v2062_v55, %v4599_v49  ;;  %v2075_v47 = vmul.f32 %v2062_v55, %v4602_v61 }
 0x228   : > { %v4609_v59 = vsel %vm636_vm8, %v1908_v60, %v1909_v41  ;;  %v4612_v4 = vsel %vm657_vm9, %v1909_v41, 0.0  ;;  %v4615_v2 = vsel %vm636_vm8, %v1911_v46, %v1912_v6  ;;  %v4618_v57 = vsel %vm657_vm9, %v1912_v6, 0.0 }
 0x229   : > { %v2080_v62 = vadd.f32 %v2072_v33, %v2023_v11  ;;  %v2081_v8 = vadd.f32 %v2073_v22, %v2024_v32  ;;  %v2082_v23 = vadd.f32 %v2074_v14, %v2025_v19  ;;  %v2083_v5 = vadd.f32 %v2075_v47, %v2026_v20 }
 0x22a   : > { %v2375_v56 = vpop.permute.xlu0 %2374  ;;  %v2076_v36 = vmul.f32 %v2066_v18, %v4609_v59  ;;  %v2077_v55 = vmul.f32 %v2066_v18, %v4612_v4  ;;  %v2078_v35 = vmul.f32 %v2070_v7, %v4615_v2  ;;  %v2079_v25 = vmul.f32 %v2070_v7, %v4618_v57 }
 0x22b   : > { %v2379_v42 = vpop.permute.xlu1 %2378  ;;  %2096 = vrot.lane.b32.xlu0 %v2080_v62, %s3424_s21  ;;  %2098 = vrot.lane.b32.xlu1 %v2081_v8, %s3424_s21  ;;  %v2340_v11 = vmul.f32 %v2326_v45, %v4540_v13  ;;  %v2341_v32 = vmul.f32 %v2326_v45, %v4537_v17  ;;  %v2343_v18 = vmul.f32 %v2330_v21, %v4543_v51 }
 0x22c   : > { %v2084_v29 = vadd.f32 %v2076_v36, %v2027_v63  ;;  %v2085_v0 = vadd.f32 %v2077_v55, %v2028_v24  ;;  %v2086_v48 = vadd.f32 %v2078_v35, %v2029_v31  ;;  %v2087_v3 = vadd.f32 %v2079_v25, %v2030_v40 }
 0x22d   : > { %v2389_v20 = vmul.f32 %v2375_v56, %v4505_v50  ;;  %v2390_v7 = vmul.f32 %v2375_v56, %v4508_v27  ;;  %v2391_v43 = vmul.f32 %v2379_v42, %v4511_v26  ;;  %v2345_v63 = vmul.f32 %v2334_v58, %v4557_v9 }
 0x22e   : > { %v2383_v19 = vpop.permute.xlu0 %2382  ;;  %v2392_v24 = vmul.f32 %v2379_v42, %v4514_v28  ;;  %v2342_v31 = vmul.f32 %v2330_v21, %v4546_v53  ;;  %v2347_v40 = vmul.f32 %v2338_v16, %v4563_v34  ;;  %v2344_v56 = vmul.f32 %v2334_v58, %v4560_v10 }
 0x22f   : > { %v2387_v30 = vpop.permute.xlu1 %2386  ;;  %2102 = vrot.lane.b32.xlu1 %v2083_v5, %s3424_s21  ;;  %2100 = vrot.lane.b32.xlu0 %v2082_v23, %s3424_s21  ;;  %v2394_v45 = vmul.f32 %v2383_v19, %v4520_v1  ;;  %v2398_v39 = vadd.f32 %v2390_v7, %v2341_v32  ;;  %v2393_v38 = vmul.f32 %v2383_v19, %v4517_v52 }
 0x230   : > { %v2397_v60 = vadd.f32 %v2389_v20, %v2340_v11  ;;  %v2400_v41 = vadd.f32 %v2392_v24, %v2343_v18  ;;  %v2396_v6 = vmul.f32 %v2387_v30, %v4526_v37  ;;  %v2399_v22 = vadd.f32 %v2391_v43, %v2342_v31 }
 0x231   : > { %v2402_v46 = vadd.f32 %v2394_v45, %v2345_v63  ;;  %v2395_v14 = vmul.f32 %v2387_v30, %v4523_v44  ;;  %v2346_v35 = vmul.f32 %v2338_v16, %v4566_v54  ;;  %v2401_v32 = vadd.f32 %v2393_v38, %v2344_v56 }
 0x232   : > { %v2432_v33 = vpop.permute.xlu0 %2431  ;;  %v2404_v21 = vadd.f32 %v2396_v6, %v2347_v40 }
 0x233   : > { %v2446_v47 = vmul.f32 %v2432_v33, %v4593_v15  ;;  %v2447_v62 = vmul.f32 %v2432_v33, %v4596_v12  ;;  %v2436_v8 = vpop.permute.xlu1 %2435  ;;  %2106 = vrot.lane.b32.xlu1 %v2085_v0, %s3424_s21  ;;  %2104 = vrot.lane.b32.xlu0 %v2084_v29, %s3424_s21  ;;  %v2403_v18 = vadd.f32 %v2395_v14, %v2346_v35 }
 0x234   : > { %v2448_v23 = vmul.f32 %v2436_v8, %v4599_v49  ;;  %v2449_v5 = vmul.f32 %v2436_v8, %v4602_v61 }
 0x235   : > { %v2454_v36 = vadd.f32 %v2446_v47, %v2397_v60  ;;  %v2455_v55 = vadd.f32 %v2447_v62, %v2398_v39 }
 0x236   : > { %v2456_v25 = vadd.f32 %v2448_v23, %v2399_v22  ;;  %v2457_v42 = vadd.f32 %v2449_v5, %v2400_v41  ;;  %v2440_v11 = vpop.permute.xlu0 %2439 }
 0x237   : > { %v2450_v19 = vmul.f32 %v2440_v11, %v4609_v59  ;;  %v2451_v0 = vmul.f32 %v2440_v11, %v4612_v4  ;;  %v2444_v29 = vpop.permute.xlu1 %2443  ;;  %2110 = vrot.lane.b32.xlu1 %v2087_v3, %s3424_s21  ;;  %2108 = vrot.lane.b32.xlu0 %v2086_v48, %s3424_s21  ;;  %s4868_s21 = sld [smem:[#allocation15_spill]] }
 0x238   : > { %v2452_v58 = vmul.f32 %v2444_v29, %v4615_v2  ;;  %v2453_v20 = vmul.f32 %v2444_v29, %v4618_v57 }
 0x239   : > { %v2458_v7 = vadd.f32 %v2450_v19, %v2401_v32  ;;  %v2459_v16 = vadd.f32 %v2451_v0, %v2402_v46 }
 0x23a   : > { %v2460_v43 = vadd.f32 %v2452_v58, %v2403_v18  ;;  %v2461_v30 = vadd.f32 %v2453_v20, %v2404_v21  ;;  %v2155_v63 = vpop.permute.xlu0 %2154 }
 0x23b   : > { %v2159_v24 = vpop.permute.xlu1 %2158  ;;  %2472 = vrot.lane.b32.xlu1 %v2455_v55, %s3425_s19  ;;  %2470 = vrot.lane.b32.xlu0 %v2454_v36, %s3425_s19  ;;  %v2169_v48 = vmul.f32 %v2155_v63, %v4540_v13  ;;  %v2170_v40 = vmul.f32 %v2155_v63, %v4537_v17 }
 0x23c   : > { %v2171_v39 = vmul.f32 %v2159_v24, %v4546_v53  ;;  %v2172_v46 = vmul.f32 %v2159_v24, %v4543_v51 }
 0x23d   : > { %s3002_s4 = sshll.u32 %s4868_s21, 3  ;;  %s3267_s21 = scalar_lea.vmem %s3266_s10, 1024 }
 0x23e   : > { %v2163_v45 = vpop.permute.xlu0 %2162  ;;  %s2628_s27 = sadd.s32 %s3399_s22, %s3002_s4  ;;  %s4870_s22 = sld [smem:[#allocation29_spill]] }
 0x23f   : > { %v2167_v31 = vpop.permute.xlu1 %2166  ;;  %2476 = vrot.lane.b32.xlu1 %v2457_v42, %s3425_s19  ;;  %2474 = vrot.lane.b32.xlu0 %v2456_v25, %s3425_s19  ;;  %v2173_v17 = vmul.f32 %v2163_v45, %v4560_v10  ;;  %s3003_s5 = sshll.u32 %s2628_s27, 7 }
 0x240   : > { %v2175_v47 = vmul.f32 %v2167_v31, %v4566_v54 }
 0x242   : > { %v2204_v3 = vpop.permute.xlu0 %2203 }
 0x243   : > { %v2218_v38 = vmul.f32 %v2204_v3, %v4505_v50  ;;  %v2219_v60 = vmul.f32 %v2204_v3, %v4508_v27  ;;  %v2208_v41 = vpop.permute.xlu1 %2207  ;;  %2480 = vrot.lane.b32.xlu1 %v2459_v16, %s3425_s19  ;;  %2478 = vrot.lane.b32.xlu0 %v2458_v7, %s3425_s19  ;;  %v2174_v27 = vmul.f32 %v2163_v45, %v4557_v9 }
 0x244   : > { %v2220_v6 = vmul.f32 %v2208_v41, %v4511_v26  ;;  %v2221_v13 = vmul.f32 %v2208_v41, %v4514_v28  ;;  %v2176_v26 = vmul.f32 %v2167_v31, %v4563_v34  ;;  %s4871_s8 = smov %s4870_s22  ;;  %s4723_s17 = scalar_lea.hbm %s4870_s22, %s3003_s5 }
 0x245   : > { %v2226_v33 = vadd.f32 %v2218_v38, %v2169_v48  ;;  %v2227_v22 = vadd.f32 %v2219_v60, %v2170_v40 }
 0x246   : > { %v2228_v53 = vadd.f32 %v2220_v6, %v2171_v39  ;;  %v2229_v14 = vadd.f32 %v2221_v13, %v2172_v46  ;;  %v2212_v50 = vpop.permute.xlu0 %2211 }
 0x247   : > { %v2222_v51 = vmul.f32 %v2212_v50, %v4517_v52  ;;  %v2223_v62 = vmul.f32 %v2212_v50, %v4520_v1  ;;  %v2216_v8 = vpop.permute.xlu1 %2215  ;;  %2484 = vrot.lane.b32.xlu1 %v2461_v30, %s3425_s19  ;;  %2482 = vrot.lane.b32.xlu0 %v2460_v43, %s3425_s19  ;;  %s525_s19 = scalar_lea.vmem [#allocation8], %s3733_s30 }
 0x248   : > { %v2224_v28 = vmul.f32 %v2216_v8, %v4523_v44  ;;  %v2225_v10 = vmul.f32 %v2216_v8, %v4526_v37  ;;  %s2631_s30 = sshll.u32 %s525_s19, 4  ;;  %s4717_s30 = int_to_ptr.vmem [resolvable:$true] %s2631_s30 }
 0x249   : > { %v2230_v21 = vadd.f32 %v2222_v51, %v2173_v17  ;;  %v2231_v23 = vadd.f32 %v2223_v62, %v2174_v27  ;;  %s3261_s24 = scalar_lea.vmem %s4717_s30, 512  ;;  %p3268_p11 = scmp.lt.s32.totalorder %s4717_s30, %s3266_s10 }
 0x24a   : > { %v2232_v9 = vadd.f32 %v2224_v28, %v2175_v47  ;;  %v2233_v5 = vadd.f32 %v2225_v10, %v2176_v26  ;;  %v2261_v54 = vpop.permute.xlu0 %2260  ;;  %p3262_p6 = scmp.ne.s32.totalorder %s4717_s30, %s3261_s24  ;;  %p3269_p12 = scmp.lt.s32.totalorder %s3267_s21, %s3261_s24 }
 0x24b   : > { %v2275_v52 = vmul.f32 %v2261_v54, %v4593_v15  ;;  %v2276_v1 = vmul.f32 %v2261_v54, %v4596_v12  ;;  %v2265_v56 = vpop.permute.xlu1 %2264 }
 0x24c   : > { %v2277_v34 = vmul.f32 %v2265_v56, %v4599_v49  ;;  %v2278_v36 = vmul.f32 %v2265_v56, %v4602_v61  ;;  %p3263_p1 = pnand %p3262_p6, %p4872_p10  ;;  %p3270_p7 = por %p3269_p12, %p3268_p11 }
 0x24d   : > { %v2283_v55 = vadd.f32 %v2275_v52, %v2226_v33  ;;  %v2284_v35 = vadd.f32 %v2276_v1, %v2227_v22 }
 0x24e   : > { %v2269_v25 = vpop.permute.xlu0 %2268  ;;  %v2285_v44 = vadd.f32 %v2277_v34, %v2228_v53  ;;  %v2286_v42 = vadd.f32 %v2278_v36, %v2229_v14  ;;  %p3264_p3 = pneg %p3263_p1 }
 0x24f   : > { %v2279_v37 = vmul.f32 %v2269_v25, %v4609_v59  ;;  %v2280_v11 = vmul.f32 %v2269_v25, %v4612_v4  ;;  %v2273_v32 = vpop.permute.xlu1 %2272 }
 0x250   : > { %v2281_v19 = vmul.f32 %v2273_v32, %v4615_v2  ;;  %v2282_v15 = vmul.f32 %v2273_v32, %v4618_v57  ;;  %p3271_p4 = pnand %p3270_p7, %p3264_p3 }
 0x251   : > { %v2287_v12 = vadd.f32 %v2279_v37, %v2230_v21  ;;  %v2288_v0 = vadd.f32 %v2280_v11, %v2231_v23 }
 0x252   : > { %v2289_v29 = vadd.f32 %v2281_v19, %v2232_v9  ;;  %v2290_v49 = vadd.f32 %v2282_v15, %v2233_v5  ;;  %v2536_v18 = vpop.permute.xlu0 %2535 }
 0x253   : > { %v2540_v61 = vpop.permute.xlu1 %2539 }
 0x256   : > { %v2544_v58 = vpop.permute.xlu0 %2543 }
 0x257   : > { %v4688_v20 = vpop.permute.xlu1 %2547 }
 0x29d   : > { %v2097_v7 = vpop.permute.xlu0 %2096  ;;  %v2099_v16 = vpop.permute.xlu1 %2098 }
 0x29e   : > { %v2120_v2 = vsel %vm856_vm10, 0.0, %v2097_v7  ;;  %v2121_v57 = vsel %vm856_vm10, 0.0, %v2099_v16 }
 0x29f   : > { %v2291_v45 = vadd.f32 %v2283_v55, %v2120_v2  ;;  %v2292_v31 = vadd.f32 %v2284_v35, %v2121_v57 }
 0x2a1   : > { %v2101_v43 = vpop.permute.xlu0 %2100  ;;  %v2103_v59 = vpop.permute.xlu1 %2102 }
 0x2a2   : > { %v2122_v48 = vsel %vm856_vm10, 0.0, %v2101_v43  ;;  %v2123_v3 = vsel %vm856_vm10, 0.0, %v2103_v59 }
 0x2a3   : > { %v2293_v6 = vadd.f32 %v2285_v44, %v2122_v48  ;;  %v2294_v13 = vadd.f32 %v2286_v42, %v2123_v3 }
 0x2a5   : > { %v2105_v30 = vpop.permute.xlu0 %2104  ;;  %v2107_v4 = vpop.permute.xlu1 %2106 }
 0x2a6   : > { %v2124_v33 = vsel %vm856_vm10, 0.0, %v2105_v30  ;;  %v2125_v22 = vsel %vm856_vm10, 0.0, %v2107_v4 }
 0x2a7   : > { %v2295_v28 = vadd.f32 %v2287_v12, %v2124_v33  ;;  %v2296_v10 = vadd.f32 %v2288_v0, %v2125_v22 }
 0x2a9   : > { %v2109_v63 = vpop.permute.xlu0 %2108  ;;  %v2111_v24 = vpop.permute.xlu1 %2110 }
 0x2aa   : > { %v2126_v21 = vsel %vm856_vm10, 0.0, %v2109_v63  ;;  %v2127_v52 = vsel %vm856_vm10, 0.0, %v2111_v24 }
 0x2ab   : > { %v2297_v25 = vadd.f32 %v2289_v29, %v2126_v21  ;;  %v2298_v44 = vadd.f32 %v2290_v49, %v2127_v52 }
 0x2ad   : > { %v2471_v40 = vpop.permute.xlu0 %2470  ;;  %v2473_v39 = vpop.permute.xlu1 %2472 }
 0x2ae   : > { %v2494_v38 = vsel %vm1231_vm11, %v2471_v40, 0.0  ;;  %v2495_v60 = vsel %vm1231_vm11, %v2473_v39, 0.0 }
 0x2af   : > { %v2502_v41 = vadd.f32 %v2494_v38, %v2291_v45  ;;  %v2503_v46 = vadd.f32 %v2495_v60, %v2292_v31 }
 0x2b1   : > { %v2550_v17 = vadd.f32 %v2536_v18, %v2502_v41  ;;  %v2551_v53 = vadd.f32 %v2536_v18, %v2503_v46  ;;  %v2475_v14 = vpop.permute.xlu0 %2474  ;;  %v2477_v50 = vpop.permute.xlu1 %2476 }
 0x2b2   : > { %v2496_v27 = vsel %vm1231_vm11, %v2475_v14, 0.0  ;;  %v2497_v47 = vsel %vm1231_vm11, %v2477_v50, 0.0 }
 0x2b3   : > { %v2993_v51 = vmul.f32 -1.442695, %v2550_v17  ;;  %v2994_v62 = vmul.f32 -1.442695, %v2551_v53  ;;  %v2504_v8 = vadd.f32 %v2496_v27, %v2293_v6  ;;  %v2505_v26 = vadd.f32 %v2497_v47, %v2294_v13 }
 0x2b5   : > { %3173 = vpow2.f32 %v2993_v51  ;;  %v2552_v23 = vadd.f32 %v2540_v61, %v2504_v8  ;;  %v2553_v9 = vadd.f32 %v2540_v61, %v2505_v26  ;;  %v2479_v5 = vpop.permute.xlu0 %2478  ;;  %v2481_v54 = vpop.permute.xlu1 %2480 }
 0x2b6   : > { %3175 = vpow2.f32 %v2994_v62  ;;  %v2498_v1 = vsel %vm1231_vm11, %v2479_v5, 0.0  ;;  %v2499_v56 = vsel %vm1231_vm11, %v2481_v54, 0.0 }
 0x2b7   : > { %v2995_v34 = vmul.f32 -1.442695, %v2552_v23  ;;  %v2996_v36 = vmul.f32 -1.442695, %v2553_v9  ;;  %v2506_v55 = vadd.f32 %v2498_v1, %v2295_v28  ;;  %v2507_v35 = vadd.f32 %v2499_v56, %v2296_v10 }
 0x2b9   : > { %3177 = vpow2.f32 %v2995_v34  ;;  %v2554_v42 = vadd.f32 %v2544_v58, %v2506_v55  ;;  %v2555_v37 = vadd.f32 %v2544_v58, %v2507_v35  ;;  %v2483_v11 = vpop.permute.xlu0 %2482  ;;  %v2485_v32 = vpop.permute.xlu1 %2484 }
 0x2ba   : > { %3179 = vpow2.f32 %v2996_v36  ;;  %v2500_v19 = vsel %vm1231_vm11, %v2483_v11, 0.0  ;;  %v2501_v15 = vsel %vm1231_vm11, %v2485_v32, 0.0 }
 0x2bb   : > { %v2997_v12 = vmul.f32 -1.442695, %v2554_v42  ;;  %v2998_v0 = vmul.f32 -1.442695, %v2555_v37  ;;  %v2508_v18 = vadd.f32 %v2500_v19, %v2297_v25  ;;  %v2509_v61 = vadd.f32 %v2501_v15, %v2298_v44 }
 0x2bd   : > { %3181 = vpow2.f32 %v2997_v12  ;;  %v2556_v7 = vadd.f32 %v4688_v20, %v2508_v18  ;;  %v2557_v29 = vadd.f32 %v4688_v20, %v2509_v61 }
 0x2be   : > { %3183 = vpow2.f32 %v2998_v0 }
 0x2bf   : > { %v3174_v49 = vpop.eup %3173  ;;  %v2999_v16 = vmul.f32 -1.442695, %v2556_v7  ;;  %v3000_v59 = vmul.f32 -1.442695, %v2557_v29 }
 0x2c0   : > { %v3176_v58 = vpop.eup %3175  ;;  %v2582_v43 = vadd.f32 1.0, %v3174_v49 }
 0x2c1   : > { %v2583_v30 = vadd.f32 1.0, %v3176_v58  ;;  %3185 = vpow2.f32 %v2999_v16 }
 0x2c2   : > { %3187 = vrcp.f32 %v2582_v43 }
 0x2c3   : > { %v3178_v4 = vpop.eup %3177  ;;  %3189 = vrcp.f32 %v2583_v30 }
 0x2c4   : > { %v3180_v63 = vpop.eup %3179  ;;  %v2584_v24 = vadd.f32 1.0, %v3178_v4  ;;  %3191 = vpow2.f32 %v3000_v59 }
 0x2c5   : > { %v2585_v2 = vadd.f32 1.0, %v3180_v63 }
 0x2c6   : > { %3193 = vrcp.f32 %v2584_v24 }
 0x2c7   : > { %v3182_v57 = vpop.eup %3181  ;;  %3195 = vrcp.f32 %v2585_v2 }
 0x2c8   : > { %v3184_v20 = vpop.eup %3183  ;;  %v2586_v45 = vadd.f32 1.0, %v3182_v57 }
 0x2c9   : > { %v2587_v31 = vadd.f32 1.0, %v3184_v20 }
 0x2ca   : > { %3197 = vrcp.f32 %v2586_v45 }
 0x2cb   : > { %v3186_v48 = vpop.eup %3185  ;;  %3199 = vrcp.f32 %v2587_v31 }
 0x2cc   : > { %v3188_v3 = vpop.eup %3187  ;;  %v2588_v40 = vadd.f32 1.0, %v3186_v48 }
 0x2cd   : > { %v3190_v39 = vpop.eup %3189  ;;  %2607 = vst.msk [vmem:[%s525_s19 - $0x2] sm:$0xfc] %vm2606_vm12, %v3188_v3 }
 0x2ce   : > { %v3192_v38 = vpop.eup %3191  ;;  %2609 = vst.msk [vmem:[%s525_s19 + $0x6] sm:$0x3] %vm2608_vm13, %v3190_v39  ;;  %3201 = vrcp.f32 %v2588_v40 }
 0x2cf   : > { %v2589_v60 = vadd.f32 1.0, %v3192_v38 }
 0x2d0   : > { %v3194_v41 = vpop.eup %3193 }
 0x2d1   : > { %v3196_v46 = vpop.eup %3195  ;;  %2610 = vst.msk [vmem:[%s525_s19 + $0x6] sm:$0xfc] %vm2606_vm12, %v3194_v41  ;;  %3203 = vrcp.f32 %v2589_v60 }
 0x2d2   : > { %2611 = vst.msk [vmem:[%s525_s19 + $0xe] sm:$0x3] %vm2608_vm13, %v3196_v46 }
 0x2d4   : > { %v3198_v6 = vpop.eup %3197 }
 0x2d5   : > { %v3200_v13 = vpop.eup %3199  ;;  %2612 = vst.msk [vmem:[%s525_s19 + $0xe] sm:$0xfc] %vm2606_vm12, %v3198_v6 }
 0x2d6   : > { %2613 = vst.msk [vmem:[%s525_s19 + $0x16] sm:$0x3] %vm2608_vm13, %v3200_v13 }
 0x2d8   : > { %v3202_v33 = vpop.eup %3201 }
 0x2d9   : > { %2614 = vst.msk [vmem:[%s525_s19 + $0x16] sm:$0xfc] %vm2606_vm12, %v3202_v33 }
 0x2db   : > { %v3204_v22 = vpop.eup %3203 }
 0x2dc   : > { %2615 = vst.msk [vmem:[%s525_s19 + $0x1e] sm:$0x3] %vm2608_vm13, %v3204_v22 }
 0x2dd   : > { %3274 = shalt.err (!%p3271_p4)
}
 0x2de   : > { %s3275_s13 = scalar_lea.hbm %s4723_s17, 512  ;;  %s3279_s27 = scalar_lea.hbm %s4871_s8, 2048 }
 0x2df   : > { %p3276_p2 = scmp.ne.s32.totalorder %s4723_s17, %s3275_s13  ;;  %p3280_p13 = scmp.lt.u32.totalorder %s4723_s17, %s4871_s8 }
 0x2e0   : > { %p3281_p0 = scmp.lt.u32.totalorder %s3279_s27, %s3275_s13  ;;  %p3283_p6 = scmp.lt.u32.totalorder %s3275_s13, %s4723_s17 }
 0x2e1   : > { %p3277_p8 = pnand %p3276_p2, %p4872_p10 }
 0x2e2   : > { %p3282_p5 = por %p3281_p0, %p3280_p13 }
 0x2e3   : > { %p3278_p9 = pneg %p3277_p8 }
 0x2e4   : > { %p3284_p1 = por %p3283_p6, %p3282_p5 }
 0x2e6   : > { %p3285_p3 = pnand %p3284_p1, %p3278_p9 }
 0x2e8   : > { %3288 = shalt.err (!%p3285_p3)
}
 0x2e9   : > { %s3427_s11 = smov 128   ;;  %s3428_s22 = smov 256  }
 0x2ea   : > { %s3429_s24 = smov 8  }
 0x2eb   : > { %3010 = dma.vmem_to_hbm [thread:$0]  (%p4872_p10), %s4717_s30, 512, %s4723_s17, %s4728_s14, %s3427_s11, %s3428_s22, %s3429_s24  }
 0x2ec PF: > { %s4873_s28 = sld [smem:[#allocation12_spill]]  ;;  %s4874_s10 = sld [smem:[#allocation23_spill]] }
 0x2ed   : > { %p3016_p11 = scmp.ge.s32.totalorder %s3415_s26, 2 }
 0x2f2   : > { %s2646_s21 = sand.u32 1, %s4873_s28   ;;  %p4875_p12 = scmp.ne.s32.totalorder %s4874_s10, 0 }
 0x2f3   : > { %s2647_s13 = scalar_lea.sflag [#allocation5], %s2646_s21 }
 0x2f4   : > { %p3013_p7 = pnand %p3016_p11, %p4875_p12 }
 0x2f6   : > { %3354 = dma.done.wait (!%p3013_p7), %s2647_s13, 512  }
 0x2f7   : > { %3356 = vsyncadd (!%p3013_p7), %s2647_s13, 4294966784  ;;  %s29_s26 = sadd.s32 1, %s3415_s26   ;;  %s4877_s29 = sld [smem:[#allocation21_spill]] }
 0x2f8   : > { %p4757_p4 = scmp.ge.s32.totalorder %s29_s26, 6   ;;  %s4878_s30 = sld [smem:[#allocation13_spill]] }
 0x2f9   : > { %s4879_s4 = sld [smem:[#allocation20_spill]]  ;;  %s4880_s27 = sld [smem:[#allocation14_spill]] }
 0x2fa   : > { %s4881_s21 = sld [smem:[#allocation19_spill]]  ;;  %s4882_s22 = sld [smem:[#allocation16_spill]] }
 0x2fb   : > { %s4883_s24 = sld [smem:[#allocation17_spill]]  ;;  %s4884_s5 = sld [smem:[#allocation18_spill]] }
 0x2fc   : > { %s4886_s13 = smov %s3391_s20  ;;  %s4887_s14 = smov %s3371_s15 }
 0x2fd   : > { %s4888_s15 = smov %s3375_s16  ;;  %s4889_s16 = smov %s4877_s29 }
 0x2fe   : > { %s4890_s17 = smov %s3383_s18  ;;  %s4891_s18 = smov %s4878_s30 }
 0x2ff   : > { %s4892_s19 = smov %s4879_s4  ;;  %s4893_s20 = smov %s4880_s27 }
 0x300   : > { %s4894_s23 = smov %s3411_s25  ;;  %28 = sbr.rel (!%p4757_p4) target bundleno = 19 (0x13), region = 186 }
 0x301   : > { %s4895_s25 = smov %s4884_s5 }
 0x307   :  { %2652 = vsyncpa [#allocation4], 1 }
 0x308   :  { %2654 = vsyncpa [#allocation4 + $0x1], 1 }
 0x309   :  { %2655 = vsyncpa [#allocation7], 1 }
 0x30a   :  { %2657 = vsyncpa [#allocation7 + $0x1], 1 }
 0x30b   :  { %2658 = vsyncpa [#allocation5], 1 }
 0x30c   :  { %2660 = vsyncpa [#allocation5 + $0x1], 1 }

</bundles_post_ra>
